<compile_context>
chip_gen: v7x
topology: tpu7x:2x2x1
jax: 0.10.0
libtpu: 0.0.40
codegen_flags: <defaults>
</compile_context>

<pallas_src>
import jax
import jax.numpy as jnp
import numpy as np
from jax.experimental import pallas as pl
from jax.experimental.pallas import tpu as pltpu

N_GRAPHEME = 168
N_VOWEL = 11
N_CONSONANT = 7
N_TOTAL = N_GRAPHEME + N_VOWEL + N_CONSONANT   # 186
N_PAD = 256                                    # out-features padded to 2*128 lanes
STATS_W = 128                                  # lane-dense per-tile stats row
TM_CAP = 512                                   # M tile cap (sublane mult of 16)
TK_CAP = 4096                                  # K tile cap (lane mult of 128)
HEADS = (
    (0, N_GRAPHEME),
    (N_GRAPHEME, N_VOWEL),
    (N_GRAPHEME + N_VOWEL, N_CONSONANT),
)


def _round_up(x, m):
    return (x + m - 1) // m * m


def _vmem_capacity_bytes():
    try:
        return int(pltpu.get_tpu_info().vmem_capacity_bytes)
    except Exception:
        return 64 * 1024 * 1024        # conservative (v7x-sized) fallback


def _plan(batch, k_dim):
    """Pick (tm, tk, w_resident, vmem_limit) against this generation's VMEM."""
    vmem_cap = _vmem_capacity_bytes()
    budget = max(16 << 20, vmem_cap - (16 << 20))    # leave >=16 MiB for Mosaic

    if batch <= 16:
        tm = batch                                    # single M tile == full dim
    else:
        # at least 2 M tiles so the "parallel" axis feeds both v7x TensorCores
        tm = min(TM_CAP, _round_up(pl.cdiv(batch, 2), 16))
    tk = min(TK_CAP, _round_up(k_dim, 128))

    def live_bytes(tm_, tk_, resident):
        x_b = 2 * tm_ * tk_ * 4                              # f32 x tiles (2 bufs)
        w_b = (2 * _round_up(k_dim, tk_) * N_PAD * 2 if resident
               else 2 * tk_ * N_PAD * 2)                     # bf16 W^T
        o_b = 2 * tm_ * N_PAD * 4                            # f32 logits block
        y_b = 2 * tm_ * 128 * 4                              # labels (lane-padded)
        small = 2 * 8 * N_PAD * 4 + 2 * 8 * STATS_W * 4      # bias + stats blocks
        return x_b + w_b + o_b + y_b + small

    while tk > 128 and live_bytes(tm, tk, False) > budget:
        tk = max(128, _round_up(tk // 2, 128))
    while tm > 16 and live_bytes(tm, tk, False) > budget:
        tm = max(16, _round_up(tm // 2, 16))

    w_resident = live_bytes(tm, tk, True) <= budget
    vmem_limit = int(min(vmem_cap,
                         max(32 << 20,
                             live_bytes(tm, tk, w_resident) + (16 << 20))))
    return tm, tk, w_resident, vmem_limit


# -----------------------------------------------------------------------------
# Fused kernel: tiled LazyLinear (x @ W^T + b) accumulating into the K-resident
# output block, with a 3-head CE / accuracy epilogue on the final K step.
# -----------------------------------------------------------------------------
def _make_kernel(batch, k_dim, tm, tk, w_resident):
    mask_k = (k_dim % tk) != 0      # only the last K block can be partial

    def kernel(x_ref, w_ref, b_ref, y_ref, o_ref, stats_ref):
        # Grid queries are bound ONLY at the top level of the kernel body;
        # their values are captured by the pl.when closures below.
        i = pl.program_id(0)
        k = pl.program_id(1)
        nk = pl.num_programs(1)

        @pl.when(k == 0)
        def _init():
            o_ref[...] = jnp.zeros_like(o_ref)

        # Fused f32 -> bf16 cast of the streaming x tile (no padded HBM copy).
        x = x_ref[...]
        if mask_k:
            colk = jax.lax.broadcasted_iota(jnp.int32, x.shape, 1) + k * tk
            x = jnp.where(colk < k_dim, x, 0)    # genuine zeros in the K tail
        x = x.astype(jnp.bfloat16)

        if w_resident:
            w = w_ref[pl.ds(k * tk, tk), :]      # W^T resident in VMEM
        else:
            w = w_ref[...]                       # streamed (zero-padded) block

        # MXU work every K step; f32 accumulate directly in the output block.
        o_ref[...] += jnp.dot(x, w, preferred_element_type=jnp.float32)

        @pl.when(k == nk - 1)
        def _finalize():
            logits = o_ref[...] + b_ref[...]                  # bias added once
            o_ref[...] = logits

            tm_b = logits.shape[0]
            y = y_ref[...]                                    # [tm_b, 3] i32
            col = jax.lax.broadcasted_iota(jnp.int32, (tm_b, N_PAD), 1)
            row = jax.lax.broadcasted_iota(jnp.int32, (tm_b, 1), 0) + i * tm
            row_valid = row < batch                           # masks M-tail rows
            neg_big = jnp.float32(-1e30)

            head_masks = [(col >= off) & (col < off + n) for off, n in HEADS]
            # Per-head max, reused for softmax stabilization and argmax.
            m = [jnp.max(jnp.where(hm, logits, neg_big), axis=1, keepdims=True)
                 for hm in head_masks]
            m_bcast = jnp.where(head_masks[0], m[0],
                                jnp.where(head_masks[1], m[1],
                                          jnp.where(head_masks[2], m[2],
                                                    jnp.float32(0.0))))
            e = jnp.exp(logits - m_bcast)        # single shared EUP pass

            loss_sums, corr_sums = [], []
            for h, (off, _n) in enumerate(HEADS):
                hm = head_masks[h]
                yh = y[:, h:h + 1]                                   # [tm_b,1]
                s = jnp.sum(jnp.where(hm, e, jnp.float32(0.0)),
                            axis=1, keepdims=True)
                lse = m[h] + jnp.log(s)
                tgt = jnp.sum(jnp.where(col == (yh + off), logits,
                                        jnp.float32(0.0)),
                              axis=1, keepdims=True)
                loss_sums.append(jnp.sum(jnp.where(row_valid, lse - tgt,
                                                   jnp.float32(0.0))))
                is_max = hm & (logits == m[h])
                pred_idx = jnp.min(jnp.where(is_max, col, N_PAD),
                                   axis=1, keepdims=True) - off
                corr_sums.append(jnp.sum(((pred_idx == yh) & row_valid)
                                         .astype(jnp.float32)))

            # Six scalars -> lanes 0..5 of a tiny (8,128) per-tile stats block.
            lane = jax.lax.broadcasted_iota(jnp.int32, (1, STATS_W), 1)
            packed = jnp.zeros((1, STATS_W), jnp.float32)
            for idx, v in enumerate(loss_sums + corr_sums):
                packed = jnp.where(lane == idx, v, packed)
            sub = jax.lax.broadcasted_iota(jnp.int32, (8, STATS_W), 0)
            stats_ref[...] = jnp.where(sub == 0, packed, jnp.float32(0.0))

    return kernel


# -----------------------------------------------------------------------------
# Forward: LazyLinear on the flattened image (lazy in_features inference) plus
# 3-head cross-entropy / accuracy metrics.  Returns (loss, metrics, pred).
# -----------------------------------------------------------------------------
@jax.jit
def bengali_classifier_forward(x, y, weight, bias):
    batch = x.shape[0]
    x_flat = x.reshape(batch, -1)
    k_dim = x_flat.shape[1]            # LazyLinear: in_features inferred here

    tm, tk, w_resident, vmem_limit = _plan(batch, k_dim)
    m_tiles = pl.cdiv(batch, tm)
    k_tiles = pl.cdiv(k_dim, tk)
    k_w = k_tiles * tk                 # W^T padded K (zero rows past k_dim)

    # Only the small operands are padded / cast outside the kernel; the big x
    # stream is consumed as-is (f32, unpadded) and cast to bf16 on the VPU.
    w_pad = jnp.zeros((k_w, N_PAD), jnp.bfloat16).at[:k_dim, :N_TOTAL].set(
        weight.T.astype(jnp.bfloat16))             # PyTorch weight: [out, in]
    b_pad = jnp.zeros((1, N_PAD), jnp.float32).at[:, :N_TOTAL].set(
        bias.astype(jnp.float32)[None, :])
    y32 = y.astype(jnp.int32)

    w_spec = (pl.BlockSpec((k_w, N_PAD), lambda i, k: (0, 0)) if w_resident
              else pl.BlockSpec((tk, N_PAD), lambda i, k: (k, 0)))

    logits, stats = pl.pallas_call(
        _make_kernel(batch, k_dim, tm, tk, w_resident),
        out_shape=(
            jax.ShapeDtypeStruct((batch, N_PAD), jnp.float32),
            jax.ShapeDtypeStruct((m_tiles * 8, STATS_W), jnp.float32),
        ),
        grid=(m_tiles, k_tiles),                   # M parallel, K (reduction) last
        in_specs=[
            pl.BlockSpec((tm, tk), lambda i, k: (i, k)),      # x       (f32)
            w_spec,                                            # W^T     (bf16)
            pl.BlockSpec((1, N_PAD), lambda i, k: (0, 0)),     # bias    (f32)
            pl.BlockSpec((tm, 3), lambda i, k: (i, 0)),        # labels  (i32)
        ],
        out_specs=(
            pl.BlockSpec((tm, N_PAD), lambda i, k: (i, 0)),    # logits (acc.)
            pl.BlockSpec((8, STATS_W), lambda i, k: (i, 0)),   # per-tile sums
        ),
        compiler_params=pltpu.CompilerParams(
            dimension_semantics=("parallel", "arbitrary"),
            vmem_limit_bytes=vmem_limit,
        ),
    )(x_flat, w_pad, b_pad, y32)

    sums = jnp.sum(stats, axis=0)                  # non-data sublanes are zero
    losses = sums[0:3] / batch
    accs = sums[3:6] / batch
    pred = logits[:, :N_TOTAL]                     # the LazyLinear output

    ac_loss = losses[0] + losses[1] + losses[2]
    metrics = {
        "loss": ac_loss,
        "loss_grapheme": losses[0],
        "loss_vowel": losses[1],
        "loss_consonant": losses[2],
        "acc_grapheme": accs[0],
        "acc_vowel": accs[1],
        "acc_consonant": accs[2],
    }
    return ac_loss, metrics, pred


# -----------------------------------------------------------------------------
# Pure-JAX reference (inputs rounded to bf16, matching the kernel's operands).
# -----------------------------------------------------------------------------
def reference_forward(x, y, weight, bias):
    batch = x.shape[0]
    xf = x.reshape(batch, -1).astype(jnp.bfloat16).astype(jnp.float32)
    wf = weight.astype(jnp.bfloat16).astype(jnp.float32)
    logits = xf @ wf.T + bias.astype(jnp.float32)
    losses, accs = [], []
    for h, (off, n) in enumerate(HEADS):
        lg = logits[:, off:off + n]
        tgt = y[:, h]
        lse = jax.scipy.special.logsumexp(lg, axis=1)
        tgt_logit = jnp.take_along_axis(lg, tgt[:, None], axis=1)[:, 0]
        losses.append(jnp.mean(lse - tgt_logit))
        accs.append(jnp.mean((jnp.argmax(lg, axis=1) == tgt).astype(jnp.float32)))
    return jnp.stack(losses), jnp.stack(accs), logits


if __name__ == "__main__":
    key = jax.random.PRNGKey(0)
    kx, kw, kb, ky0, ky1, ky2 = jax.random.split(key, 6)

    B, C, H, W = 2, 4, 16, 16
    F_in = C * H * W

    x = jax.random.normal(kx, (B, C, H, W), dtype=jnp.float32)
    # PyTorch LazyLinear layout: weight [out_features, in_features], bias [out].
    weight = jax.random.normal(kw, (N_TOTAL, F_in), dtype=jnp.float32) * 0.02
    bias = jax.random.normal(kb, (N_TOTAL,), dtype=jnp.float32) * 0.01
    y = jnp.stack(
        [
            jax.random.randint(ky0, (B,), 0, N_GRAPHEME),
            jax.random.randint(ky1, (B,), 0, N_VOWEL),
            jax.random.randint(ky2, (B,), 0, N_CONSONANT),
        ],
        axis=1,
    ).astype(jnp.int32)

    ac_loss, metrics, pred = bengali_classifier_forward(x, y, weight, bias)
    jax.block_until_ready((ac_loss, metrics, pred))

    ref_losses, ref_accs, ref_logits = reference_forward(x, y, weight, bias)
    got_losses = jnp.stack(
        [metrics["loss_grapheme"], metrics["loss_vowel"], metrics["loss_consonant"]])
    got_accs = jnp.stack(
        [metrics["acc_grapheme"], metrics["acc_vowel"], metrics["acc_consonant"]])

    assert pred.shape == (B, N_TOTAL)
    assert np.allclose(np.asarray(pred), np.asarray(ref_logits), rtol=2e-2, atol=2e-2)
    assert np.allclose(np.asarray(got_losses), np.asarray(ref_losses),
                       rtol=2e-2, atol=2e-2)
    assert np.allclose(np.asarray(got_accs), np.asarray(ref_accs), atol=1e-5)
    assert np.isfinite(float(ac_loss))

    print("KERNEL_OK")
</pallas_src>

<mosaic_0001>
module attributes {stable_mosaic.version = 11 : i64} {
  func.func @kernel(%arg0: i32, %arg1: i32, %arg2: memref<2x1024xf32, #tpu.memory_space<vmem>>, %arg3: memref<1024x256xbf16, #tpu.memory_space<vmem>>, %arg4: memref<1x256xf32, #tpu.memory_space<vmem>>, %arg5: memref<2x3xi32, #tpu.memory_space<vmem>>, %arg6: memref<2x256xf32, #tpu.memory_space<vmem>>, %arg7: memref<8x128xf32, #tpu.memory_space<vmem>>) attributes {dimension_semantics = [#tpu.dimension_semantics<parallel>, #tpu.dimension_semantics<arbitrary>], iteration_bounds = array<i64: 1, 1>, scalar_prefetch = 0 : i64, scratch_operands = 0 : i64, tpu.core_type = #tpu.core_type<tc>, window_params = [{transform_indices = @transform_0, window_bounds = array<i64: 2, 1024>}, {pipeline_mode = #tpu.pipeline_mode<synchronous>, transform_indices = @transform_1, window_bounds = array<i64: 1024, 256>}, {pipeline_mode = #tpu.pipeline_mode<synchronous>, transform_indices = @transform_2, window_bounds = array<i64: 1, 256>}, {transform_indices = @transform_3, window_bounds = array<i64: 2, 3>}, {transform_indices = @transform_4, window_bounds = array<i64: 2, 256>}, {transform_indices = @transform_5, window_bounds = array<i64: 8, 128>}]} {
    %c0_i32 = arith.constant 0 : i32
    %0 = arith.cmpi eq, %arg1, %c0_i32 : i32
    %1 = arith.extui %0 : i1 to i32
    %c0_i32_0 = arith.constant 0 : i32
    %2 = arith.cmpi ne, %1, %c0_i32_0 : i32
    scf.if %2 {
      %cst_9 = arith.constant 0.000000e+00 : f32
      %15 = vector.broadcast %cst_9 : f32 to vector<2x256xf32>
      %c0_10 = arith.constant 0 : index
      %c0_11 = arith.constant 0 : index
      %16 = vector.load %arg6[%c0_10, %c0_11] : memref<2x256xf32, #tpu.memory_space<vmem>>, vector<2x256xf32>
      tpu.vector_store %arg6[%c0_10, %c0_11], %15 {strides = array<i32>} : memref<2x256xf32, #tpu.memory_space<vmem>>, vector<2x256xf32>,
    } else {
    }
    %c0 = arith.constant 0 : index
    %c0_1 = arith.constant 0 : index
    %3 = vector.load %arg2[%c0, %c0_1] : memref<2x1024xf32, #tpu.memory_space<vmem>>, vector<2x1024xf32>
    %4 = arith.truncf %3 : vector<2x1024xf32> to vector<2x1024xbf16>
    %c1024_i32 = arith.constant 1024 : i32
    %5 = arith.muli %arg1, %c1024_i32 : i32
    %6 = arith.index_cast %5 : i32 to index
    %c0_2 = arith.constant 0 : index
    %7 = vector.load %arg3[%6, %c0_2] : memref<1024x256xbf16, #tpu.memory_space<vmem>>, vector<1024x256xbf16>
    %c0_3 = arith.constant 0 : index
    %c0_4 = arith.constant 0 : index
    %8 = vector.load %arg6[%c0_3, %c0_4] : memref<2x256xf32, #tpu.memory_space<vmem>>, vector<2x256xf32>
    %cst = arith.constant dense<0.000000e+00> : vector<2x256xf32>
    %9 = tpu.matmul %4, %7, %cst {dimension_numbers = #tpu.dot_dimension_numbers<[1], [0], [0], [1], [0, 0, 1, 1], [], []>} : vector<2x1024xbf16>, vector<1024x256xbf16>, vector<2x256xf32> -> vector<2x256xf32>
    %10 = arith.addf %8, %9 : vector<2x256xf32>
    %c0_5 = arith.constant 0 : index
    %c0_6 = arith.constant 0 : index
    %11 = vector.load %arg6[%c0_5, %c0_6] : memref<2x256xf32, #tpu.memory_space<vmem>>, vector<2x256xf32>
    tpu.vector_store %arg6[%c0_5, %c0_6], %10 {strides = array<i32>} : memref<2x256xf32, #tpu.memory_space<vmem>>, vector<2x256xf32>,
    %c0_i32_7 = arith.constant 0 : i32
    %12 = arith.cmpi eq, %arg1, %c0_i32_7 : i32
    %13 = arith.extui %12 : i1 to i32
    %c0_i32_8 = arith.constant 0 : i32
    %14 = arith.cmpi ne, %13, %c0_i32_8 : i32
    scf.if %14 {
      %c0_9 = arith.constant 0 : index
      %c0_10 = arith.constant 0 : index
      %15 = vector.load %arg6[%c0_9, %c0_10] : memref<2x256xf32, #tpu.memory_space<vmem>>, vector<2x256xf32>
      %c0_11 = arith.constant 0 : index
      %c0_12 = arith.constant 0 : index
      %16 = vector.load %arg4[%c0_11, %c0_12] : memref<1x256xf32, #tpu.memory_space<vmem>>, vector<1x256xf32>
      %17 = vector.broadcast %16 : vector<1x256xf32> to vector<2x256xf32>
      %18 = arith.addf %15, %17 : vector<2x256xf32>
      %c0_13 = arith.constant 0 : index
      %c0_14 = arith.constant 0 : index
      %19 = vector.load %arg6[%c0_13, %c0_14] : memref<2x256xf32, #tpu.memory_space<vmem>>, vector<2x256xf32>
      tpu.vector_store %arg6[%c0_13, %c0_14], %18 {strides = array<i32>} : memref<2x256xf32, #tpu.memory_space<vmem>>, vector<2x256xf32>,
      %c0_15 = arith.constant 0 : index
      %c0_16 = arith.constant 0 : index
      %20 = vector.load %arg5[%c0_15, %c0_16] : memref<2x3xi32, #tpu.memory_space<vmem>>, vector<2x3xi32>
      %21 = tpu.iota {dimensions = array<i32: 1>} : vector<2x256xi32>
      %22 = tpu.iota {dimensions = array<i32: 0>} : vector<2x1xi32>
      %c2_i32 = arith.constant 2 : i32
      %23 = arith.muli %arg0, %c2_i32 : i32
      %24 = vector.broadcast %23 : i32 to vector<2x1xi32>
      %25 = arith.addi %22, %24 : vector<2x1xi32>
      %c2_i32_17 = arith.constant 2 : i32
      %26 = vector.broadcast %c2_i32_17 : i32 to vector<2x1xi32>
      %27 = arith.cmpi slt, %25, %26 : vector<2x1xi32>
      %c0_i32_18 = arith.constant 0 : i32
      %28 = vector.broadcast %c0_i32_18 : i32 to vector<2x256xi32>
      %29 = arith.cmpi sge, %21, %28 : vector<2x256xi32>
      %c168_i32 = arith.constant 168 : i32
      %30 = vector.broadcast %c168_i32 : i32 to vector<2x256xi32>
      %31 = arith.cmpi slt, %21, %30 : vector<2x256xi32>
      %32 = arith.andi %29, %31 : vector<2x256xi1>
      %c168_i32_19 = arith.constant 168 : i32
      %33 = vector.broadcast %c168_i32_19 : i32 to vector<2x256xi32>
      %34 = arith.cmpi sge, %21, %33 : vector<2x256xi32>
      %c179_i32 = arith.constant 179 : i32
      %35 = vector.broadcast %c179_i32 : i32 to vector<2x256xi32>
      %36 = arith.cmpi slt, %21, %35 : vector<2x256xi32>
      %37 = arith.andi %34, %36 : vector<2x256xi1>
      %c179_i32_20 = arith.constant 179 : i32
      %38 = vector.broadcast %c179_i32_20 : i32 to vector<2x256xi32>
      %39 = arith.cmpi sge, %21, %38 : vector<2x256xi32>
      %c186_i32 = arith.constant 186 : i32
      %40 = vector.broadcast %c186_i32 : i32 to vector<2x256xi32>
      %41 = arith.cmpi slt, %21, %40 : vector<2x256xi32>
      %42 = arith.andi %39, %41 : vector<2x256xi1>
      %cst_21 = arith.constant -1.000000e+30 : f32
      %43 = vector.broadcast %cst_21 : f32 to vector<2x256xf32>
      %44 = arith.select %32, %18, %43 : vector<2x256xi1>, vector<2x256xf32>
      %cst_22 = arith.constant dense<0xFF800000> : vector<2xf32>
      %45 = vector.multi_reduction <maximumf>, %44, %cst_22 [1] : vector<2x256xf32> to vector<2xf32>
      %46 = vector.shape_cast %45 : vector<2xf32> to vector<2x1xf32>
      %cst_23 = arith.constant -1.000000e+30 : f32
      %47 = vector.broadcast %cst_23 : f32 to vector<2x256xf32>
      %48 = arith.select %37, %18, %47 : vector<2x256xi1>, vector<2x256xf32>
      %cst_24 = arith.constant dense<0xFF800000> : vector<2xf32>
      %49 = vector.multi_reduction <maximumf>, %48, %cst_24 [1] : vector<2x256xf32> to vector<2xf32>
      %50 = vector.shape_cast %49 : vector<2xf32> to vector<2x1xf32>
      %cst_25 = arith.constant -1.000000e+30 : f32
      %51 = vector.broadcast %cst_25 : f32 to vector<2x256xf32>
      %52 = arith.select %42, %18, %51 : vector<2x256xi1>, vector<2x256xf32>
      %cst_26 = arith.constant dense<0xFF800000> : vector<2xf32>
      %53 = vector.multi_reduction <maximumf>, %52, %cst_26 [1] : vector<2x256xf32> to vector<2xf32>
      %54 = vector.shape_cast %53 : vector<2xf32> to vector<2x1xf32>
      %cst_27 = arith.constant 0.000000e+00 : f32
      %55 = vector.shape_cast %54 : vector<2x1xf32> to vector<2x1xf32>
      %56 = vector.broadcast %55 : vector<2x1xf32> to vector<2x256xf32>
      %57 = vector.broadcast %cst_27 : f32 to vector<2x256xf32>
      %58 = arith.select %42, %56, %57 : vector<2x256xi1>, vector<2x256xf32>
      %59 = vector.shape_cast %50 : vector<2x1xf32> to vector<2x1xf32>
      %60 = vector.broadcast %59 : vector<2x1xf32> to vector<2x256xf32>
      %61 = arith.select %37, %60, %58 : vector<2x256xi1>, vector<2x256xf32>
      %62 = vector.shape_cast %46 : vector<2x1xf32> to vector<2x1xf32>
      %63 = vector.broadcast %62 : vector<2x1xf32> to vector<2x256xf32>
      %64 = arith.select %32, %63, %61 : vector<2x256xi1>, vector<2x256xf32>
      %65 = arith.subf %18, %64 : vector<2x256xf32>
      %66 = math.exp %65 : vector<2x256xf32>
      %67 = vector.extract_strided_slice %20 {offsets = [0, 0], sizes = [2, 1], strides = [1, 1]} : vector<2x3xi32> to vector<2x1xi32>
      %cst_28 = arith.constant 0.000000e+00 : f32
      %68 = vector.broadcast %cst_28 : f32 to vector<2x256xf32>
      %69 = arith.select %32, %66, %68 : vector<2x256xi1>, vector<2x256xf32>
      %cst_29 = arith.constant dense<0.000000e+00> : vector<2xf32>
      %70 = vector.multi_reduction <add>, %69, %cst_29 [1] : vector<2x256xf32> to vector<2xf32>
      %71 = vector.shape_cast %70 : vector<2xf32> to vector<2x1xf32>
      %72 = math.log %71 : vector<2x1xf32>
      %73 = arith.addf %46, %72 : vector<2x1xf32>
      %c0_i32_30 = arith.constant 0 : i32
      %74 = vector.broadcast %c0_i32_30 : i32 to vector<2x1xi32>
      %75 = arith.addi %67, %74 : vector<2x1xi32>
      %76 = vector.broadcast %75 : vector<2x1xi32> to vector<2x256xi32>
      %77 = arith.cmpi eq, %21, %76 : vector<2x256xi32>
      %cst_31 = arith.constant 0.000000e+00 : f32
      %78 = vector.broadcast %cst_31 : f32 to vector<2x256xf32>
      %79 = arith.select %77, %18, %78 : vector<2x256xi1>, vector<2x256xf32>
      %cst_32 = arith.constant dense<0.000000e+00> : vector<2xf32>
      %80 = vector.multi_reduction <add>, %79, %cst_32 [1] : vector<2x256xf32> to vector<2xf32>
      %81 = vector.shape_cast %80 : vector<2xf32> to vector<2x1xf32>
      %82 = arith.subf %73, %81 : vector<2x1xf32>
      %cst_33 = arith.constant 0.000000e+00 : f32
      %83 = vector.broadcast %cst_33 : f32 to vector<2x1xf32>
      %84 = arith.select %27, %82, %83 : vector<2x1xi1>, vector<2x1xf32>
      %85 = vector.shape_cast %84 : vector<2x1xf32> to vector<1x2x1xf32>
      %cst_34 = arith.constant dense<0.000000e+00> : vector<1xf32>
      %86 = vector.multi_reduction <add>, %85, %cst_34 [1, 2] : vector<1x2x1xf32> to vector<1xf32>
      %87 = vector.shape_cast %86 : vector<1xf32> to vector<1x1x1xf32>
      %88 = vector.extract %87[0, 0, 0] : f32 from vector<1x1x1xf32>
      %89 = vector.broadcast %46 : vector<2x1xf32> to vector<2x256xf32>
      %90 = arith.cmpf oeq, %18, %89 : vector<2x256xf32>
      %91 = arith.andi %32, %90 : vector<2x256xi1>
      %c256_i32 = arith.constant 256 : i32
      %92 = vector.broadcast %c256_i32 : i32 to vector<2x256xi32>
      %93 = arith.select %91, %21, %92 : vector<2x256xi1>, vector<2x256xi32>
      %cst_35 = arith.constant dense<2147483647> : vector<2xi32>
      %94 = vector.multi_reduction <minsi>, %93, %cst_35 [1] : vector<2x256xi32> to vector<2xi32>
      %95 = vector.shape_cast %94 : vector<2xi32> to vector<2x1xi32>
      %c0_i32_36 = arith.constant 0 : i32
      %96 = vector.broadcast %c0_i32_36 : i32 to vector<2x1xi32>
      %97 = arith.subi %95, %96 : vector<2x1xi32>
      %98 = arith.cmpi eq, %97, %67 : vector<2x1xi32>
      %99 = arith.andi %98, %27 : vector<2x1xi1>
      %100 = arith.extui %99 : vector<2x1xi1> to vector<2x1xi32>
      %101 = arith.sitofp %100 : vector<2x1xi32> to vector<2x1xf32>
      %102 = vector.shape_cast %101 : vector<2x1xf32> to vector<1x2x1xf32>
      %cst_37 = arith.constant dense<0.000000e+00> : vector<1xf32>
      %103 = vector.multi_reduction <add>, %102, %cst_37 [1, 2] : vector<1x2x1xf32> to vector<1xf32>
      %104 = vector.shape_cast %103 : vector<1xf32> to vector<1x1x1xf32>
      %105 = vector.extract %104[0, 0, 0] : f32 from vector<1x1x1xf32>
      %106 = vector.extract_strided_slice %20 {offsets = [0, 1], sizes = [2, 1], strides = [1, 1]} : vector<2x3xi32> to vector<2x1xi32>
      %cst_38 = arith.constant 0.000000e+00 : f32
      %107 = vector.broadcast %cst_38 : f32 to vector<2x256xf32>
      %108 = arith.select %37, %66, %107 : vector<2x256xi1>, vector<2x256xf32>
      %cst_39 = arith.constant dense<0.000000e+00> : vector<2xf32>
      %109 = vector.multi_reduction <add>, %108, %cst_39 [1] : vector<2x256xf32> to vector<2xf32>
      %110 = vector.shape_cast %109 : vector<2xf32> to vector<2x1xf32>
      %111 = math.log %110 : vector<2x1xf32>
      %112 = arith.addf %50, %111 : vector<2x1xf32>
      %c168_i32_40 = arith.constant 168 : i32
      %113 = vector.broadcast %c168_i32_40 : i32 to vector<2x1xi32>
      %114 = arith.addi %106, %113 : vector<2x1xi32>
      %115 = vector.broadcast %114 : vector<2x1xi32> to vector<2x256xi32>
      %116 = arith.cmpi eq, %21, %115 : vector<2x256xi32>
      %cst_41 = arith.constant 0.000000e+00 : f32
      %117 = vector.broadcast %cst_41 : f32 to vector<2x256xf32>
      %118 = arith.select %116, %18, %117 : vector<2x256xi1>, vector<2x256xf32>
      %cst_42 = arith.constant dense<0.000000e+00> : vector<2xf32>
      %119 = vector.multi_reduction <add>, %118, %cst_42 [1] : vector<2x256xf32> to vector<2xf32>
      %120 = vector.shape_cast %119 : vector<2xf32> to vector<2x1xf32>
      %121 = arith.subf %112, %120 : vector<2x1xf32>
      %cst_43 = arith.constant 0.000000e+00 : f32
      %122 = vector.broadcast %cst_43 : f32 to vector<2x1xf32>
      %123 = arith.select %27, %121, %122 : vector<2x1xi1>, vector<2x1xf32>
      %124 = vector.shape_cast %123 : vector<2x1xf32> to vector<1x2x1xf32>
      %cst_44 = arith.constant dense<0.000000e+00> : vector<1xf32>
      %125 = vector.multi_reduction <add>, %124, %cst_44 [1, 2] : vector<1x2x1xf32> to vector<1xf32>
      %126 = vector.shape_cast %125 : vector<1xf32> to vector<1x1x1xf32>
      %127 = vector.extract %126[0, 0, 0] : f32 from vector<1x1x1xf32>
      %128 = vector.broadcast %50 : vector<2x1xf32> to vector<2x256xf32>
      %129 = arith.cmpf oeq, %18, %128 : vector<2x256xf32>
      %130 = arith.andi %37, %129 : vector<2x256xi1>
      %c256_i32_45 = arith.constant 256 : i32
      %131 = vector.broadcast %c256_i32_45 : i32 to vector<2x256xi32>
      %132 = arith.select %130, %21, %131 : vector<2x256xi1>, vector<2x256xi32>
      %cst_46 = arith.constant dense<2147483647> : vector<2xi32>
      %133 = vector.multi_reduction <minsi>, %132, %cst_46 [1] : vector<2x256xi32> to vector<2xi32>
      %134 = vector.shape_cast %133 : vector<2xi32> to vector<2x1xi32>
      %c168_i32_47 = arith.constant 168 : i32
      %135 = vector.broadcast %c168_i32_47 : i32 to vector<2x1xi32>
      %136 = arith.subi %134, %135 : vector<2x1xi32>
      %137 = arith.cmpi eq, %136, %106 : vector<2x1xi32>
      %138 = arith.andi %137, %27 : vector<2x1xi1>
      %139 = arith.extui %138 : vector<2x1xi1> to vector<2x1xi32>
      %140 = arith.sitofp %139 : vector<2x1xi32> to vector<2x1xf32>
      %141 = vector.shape_cast %140 : vector<2x1xf32> to vector<1x2x1xf32>
      %cst_48 = arith.constant dense<0.000000e+00> : vector<1xf32>
      %142 = vector.multi_reduction <add>, %141, %cst_48 [1, 2] : vector<1x2x1xf32> to vector<1xf32>
      %143 = vector.shape_cast %142 : vector<1xf32> to vector<1x1x1xf32>
      %144 = vector.extract %143[0, 0, 0] : f32 from vector<1x1x1xf32>
      %145 = vector.extract_strided_slice %20 {offsets = [0, 2], sizes = [2, 1], strides = [1, 1]} : vector<2x3xi32> to vector<2x1xi32>
      %cst_49 = arith.constant 0.000000e+00 : f32
      %146 = vector.broadcast %cst_49 : f32 to vector<2x256xf32>
      %147 = arith.select %42, %66, %146 : vector<2x256xi1>, vector<2x256xf32>
      %cst_50 = arith.constant dense<0.000000e+00> : vector<2xf32>
      %148 = vector.multi_reduction <add>, %147, %cst_50 [1] : vector<2x256xf32> to vector<2xf32>
      %149 = vector.shape_cast %148 : vector<2xf32> to vector<2x1xf32>
      %150 = math.log %149 : vector<2x1xf32>
      %151 = arith.addf %54, %150 : vector<2x1xf32>
      %c179_i32_51 = arith.constant 179 : i32
      %152 = vector.broadcast %c179_i32_51 : i32 to vector<2x1xi32>
      %153 = arith.addi %145, %152 : vector<2x1xi32>
      %154 = vector.broadcast %153 : vector<2x1xi32> to vector<2x256xi32>
      %155 = arith.cmpi eq, %21, %154 : vector<2x256xi32>
      %cst_52 = arith.constant 0.000000e+00 : f32
      %156 = vector.broadcast %cst_52 : f32 to vector<2x256xf32>
      %157 = arith.select %155, %18, %156 : vector<2x256xi1>, vector<2x256xf32>
      %cst_53 = arith.constant dense<0.000000e+00> : vector<2xf32>
      %158 = vector.multi_reduction <add>, %157, %cst_53 [1] : vector<2x256xf32> to vector<2xf32>
      %159 = vector.shape_cast %158 : vector<2xf32> to vector<2x1xf32>
      %160 = arith.subf %151, %159 : vector<2x1xf32>
      %cst_54 = arith.constant 0.000000e+00 : f32
      %161 = vector.broadcast %cst_54 : f32 to vector<2x1xf32>
      %162 = arith.select %27, %160, %161 : vector<2x1xi1>, vector<2x1xf32>
      %163 = vector.shape_cast %162 : vector<2x1xf32> to vector<1x2x1xf32>
      %cst_55 = arith.constant dense<0.000000e+00> : vector<1xf32>
      %164 = vector.multi_reduction <add>, %163, %cst_55 [1, 2] : vector<1x2x1xf32> to vector<1xf32>
      %165 = vector.shape_cast %164 : vector<1xf32> to vector<1x1x1xf32>
      %166 = vector.extract %165[0, 0, 0] : f32 from vector<1x1x1xf32>
      %167 = vector.broadcast %54 : vector<2x1xf32> to vector<2x256xf32>
      %168 = arith.cmpf oeq, %18, %167 : vector<2x256xf32>
      %169 = arith.andi %42, %168 : vector<2x256xi1>
      %c256_i32_56 = arith.constant 256 : i32
      %170 = vector.broadcast %c256_i32_56 : i32 to vector<2x256xi32>
      %171 = arith.select %169, %21, %170 : vector<2x256xi1>, vector<2x256xi32>
      %cst_57 = arith.constant dense<2147483647> : vector<2xi32>
      %172 = vector.multi_reduction <minsi>, %171, %cst_57 [1] : vector<2x256xi32> to vector<2xi32>
      %173 = vector.shape_cast %172 : vector<2xi32> to vector<2x1xi32>
      %c179_i32_58 = arith.constant 179 : i32
      %174 = vector.broadcast %c179_i32_58 : i32 to vector<2x1xi32>
      %175 = arith.subi %173, %174 : vector<2x1xi32>
      %176 = arith.cmpi eq, %175, %145 : vector<2x1xi32>
      %177 = arith.andi %176, %27 : vector<2x1xi1>
      %178 = arith.extui %177 : vector<2x1xi1> to vector<2x1xi32>
      %179 = arith.sitofp %178 : vector<2x1xi32> to vector<2x1xf32>
      %180 = vector.shape_cast %179 : vector<2x1xf32> to vector<1x2x1xf32>
      %cst_59 = arith.constant dense<0.000000e+00> : vector<1xf32>
      %181 = vector.multi_reduction <add>, %180, %cst_59 [1, 2] : vector<1x2x1xf32> to vector<1xf32>
      %182 = vector.shape_cast %181 : vector<1xf32> to vector<1x1x1xf32>
      %183 = vector.extract %182[0, 0, 0] : f32 from vector<1x1x1xf32>
      %184 = tpu.iota {dimensions = array<i32: 1>} : vector<1x128xi32>
      %cst_60 = arith.constant 0.000000e+00 : f32
      %185 = vector.broadcast %cst_60 : f32 to vector<1x128xf32>
      %c0_i32_61 = arith.constant 0 : i32
      %186 = vector.broadcast %c0_i32_61 : i32 to vector<1x128xi32>
      %187 = arith.cmpi eq, %184, %186 : vector<1x128xi32>
      %188 = vector.broadcast %88 : f32 to vector<1x128xf32>
      %189 = arith.select %187, %188, %185 : vector<1x128xi1>, vector<1x128xf32>
      %c1_i32 = arith.constant 1 : i32
      %190 = vector.broadcast %c1_i32 : i32 to vector<1x128xi32>
      %191 = arith.cmpi eq, %184, %190 : vector<1x128xi32>
      %192 = vector.broadcast %127 : f32 to vector<1x128xf32>
      %193 = arith.select %191, %192, %189 : vector<1x128xi1>, vector<1x128xf32>
      %c2_i32_62 = arith.constant 2 : i32
      %194 = vector.broadcast %c2_i32_62 : i32 to vector<1x128xi32>
      %195 = arith.cmpi eq, %184, %194 : vector<1x128xi32>
      %196 = vector.broadcast %166 : f32 to vector<1x128xf32>
      %197 = arith.select %195, %196, %193 : vector<1x128xi1>, vector<1x128xf32>
      %c3_i32 = arith.constant 3 : i32
      %198 = vector.broadcast %c3_i32 : i32 to vector<1x128xi32>
      %199 = arith.cmpi eq, %184, %198 : vector<1x128xi32>
      %200 = vector.broadcast %105 : f32 to vector<1x128xf32>
      %201 = arith.select %199, %200, %197 : vector<1x128xi1>, vector<1x128xf32>
      %c4_i32 = arith.constant 4 : i32
      %202 = vector.broadcast %c4_i32 : i32 to vector<1x128xi32>
      %203 = arith.cmpi eq, %184, %202 : vector<1x128xi32>
      %204 = vector.broadcast %144 : f32 to vector<1x128xf32>
      %205 = arith.select %203, %204, %201 : vector<1x128xi1>, vector<1x128xf32>
      %c5_i32 = arith.constant 5 : i32
      %206 = vector.broadcast %c5_i32 : i32 to vector<1x128xi32>
      %207 = arith.cmpi eq, %184, %206 : vector<1x128xi32>
      %208 = vector.broadcast %183 : f32 to vector<1x128xf32>
      %209 = arith.select %207, %208, %205 : vector<1x128xi1>, vector<1x128xf32>
      %210 = tpu.iota {dimensions = array<i32: 0>} : vector<8x128xi32>
      %c0_i32_63 = arith.constant 0 : i32
      %211 = vector.broadcast %c0_i32_63 : i32 to vector<8x128xi32>
      %212 = arith.cmpi eq, %210, %211 : vector<8x128xi32>
      %cst_64 = arith.constant 0.000000e+00 : f32
      %213 = vector.shape_cast %209 : vector<1x128xf32> to vector<1x128xf32>
      %214 = vector.broadcast %213 : vector<1x128xf32> to vector<8x128xf32>
      %215 = vector.broadcast %cst_64 : f32 to vector<8x128xf32>
      %216 = arith.select %212, %214, %215 : vector<8x128xi1>, vector<8x128xf32>
      %c0_65 = arith.constant 0 : index
      %c0_66 = arith.constant 0 : index
      %217 = vector.load %arg7[%c0_65, %c0_66] : memref<8x128xf32, #tpu.memory_space<vmem>>, vector<8x128xf32>
      tpu.vector_store %arg7[%c0_65, %c0_66], %216 {strides = array<i32>} : memref<8x128xf32, #tpu.memory_space<vmem>>, vector<8x128xf32>,
    } else {
    }
    return
  }
  func.func @transform_0(%arg0: i32, %arg1: i32) -> (i32, i32) {
    %c0_i32 = arith.constant 0 : i32
    return %arg0, %arg1 : i32, i32
  }
  func.func @transform_1(%arg0: i32, %arg1: i32) -> (i32, i32) {
    %c0_i32 = arith.constant 0 : i32
    %c0_i32_0 = arith.constant 0 : i32
    %c0_i32_1 = arith.constant 0 : i32
    return %c0_i32, %c0_i32_0 : i32, i32
  }
  func.func @transform_2(%arg0: i32, %arg1: i32) -> (i32, i32) {
    %c0_i32 = arith.constant 0 : i32
    %c0_i32_0 = arith.constant 0 : i32
    %c0_i32_1 = arith.constant 0 : i32
    return %c0_i32, %c0_i32_0 : i32, i32
  }
  func.func @transform_3(%arg0: i32, %arg1: i32) -> (i32, i32) {
    %c0_i32 = arith.constant 0 : i32
    %c0_i32_0 = arith.constant 0 : i32
    return %arg0, %c0_i32 : i32, i32
  }
  func.func @transform_4(%arg0: i32, %arg1: i32) -> (i32, i32) {
    %c0_i32 = arith.constant 0 : i32
    %c0_i32_0 = arith.constant 0 : i32
    return %arg0, %c0_i32 : i32, i32
  }
  func.func @transform_5(%arg0: i32, %arg1: i32) -> (i32, i32) {
    %c0_i32 = arith.constant 0 : i32
    %c0_i32_0 = arith.constant 0 : i32
    return %arg0, %c0_i32 : i32, i32
  }
}

</mosaic_0001>

<bundles_post_ra>
// kernel: bengali_classifier_forward.1
= control target key start
LH: loop header
LB: loop body
LE: loop exit
PB: predicated region body
PF: predicated region fallthrough
CT: control target
= control target key end

     0   :  { %v1871_v36 = vmov 1983009808   ;;  %v33_v38 = vlaneseq  ;;  %s2525_s0 = inlined_call_operand.vmem [shape: f32[2,1024], index: 0, kind: input, shape index: {}]   ;;  %s2526_s1 = inlined_call_operand.vmem [shape: bf16[1024,256], index: 1, kind: input, shape index: {}]   ;;  %s2527_s2 = inlined_call_operand.vmem [shape: f32[1,256], index: 2, kind: input, shape index: {}]   ;;  %s2528_s3 = inlined_call_operand.vmem [shape: s32[2,3], index: 3, kind: input, shape index: {}]   ;;  %s2529_s4 = inlined_call_operand.hbm [shape: f32[2,256], index: 4, kind: output, shape index: {0}]   ;;  %s2530_s5 = inlined_call_operand.vmem [shape: f32[8,128], index: 5, kind: output, shape index: {1}]  }
   0x1   :  { %v1645_v0 = vld [vmem:[%s2526_s1 + $0x4] ss:$8 sps:$4 sm:$0xff]   ;;  %v1649_v2 = vld [vmem:[%s2526_s1] ss:$8 sps:$4 sm:$0xff]   ;;  %v1651_v4 = vld [vmem:[%s2526_s1 + $0x14] ss:$8 sps:$4 sm:$0xff]   ;;  %v31_v37 = vunpack.c.l.s4 %v1871_v36 }
   0x2   :  { %v1647_v1 = vld [vmem:[%s2526_s1 + $0x204] ss:$8 sps:$4 sm:$0xff]   ;;  %854 = vmatprep.subr.bf16.mxu1 %v1645_v0  ;;  %v1650_v3 = vld [vmem:[%s2526_s1 + $0x200] ss:$8 sps:$4 sm:$0xff]   ;;  %v1653_v5 = vld [vmem:[%s2526_s1 + $0x214] ss:$8 sps:$4 sm:$0xff]  }
   0x3   :  { %936 = vmatprep.subr.bf16.mxu0 %v1647_v1  ;;  %855 = vmatpush1.bf16.msra.mxu1 %v1649_v2  ;;  %v1655_v6 = vld [vmem:[%s2526_s1 + $0x10] ss:$8 sps:$4 sm:$0xff]   ;;  %v1657_v8 = vld [vmem:[%s2526_s1 + $0x24] ss:$8 sps:$4 sm:$0xff]   ;;  %v1661_v10 = vld [vmem:[%s2526_s1 + $0x20] ss:$8 sps:$4 sm:$0xff]   ;;  %v32_v42 = vunpack.c.0.s8 %v31_v37 }
   0x4   :  { %937 = vmatpush1.bf16.msra.mxu0 %v1650_v3  ;;  %856 = vmatprep.subr.bf16.mxu1 %v1651_v4  ;;  %v1656_v7 = vld [vmem:[%s2526_s1 + $0x210] ss:$8 sps:$4 sm:$0xff]   ;;  %v1659_v9 = vld [vmem:[%s2526_s1 + $0x224] ss:$8 sps:$4 sm:$0xff]   ;;  %v1662_v11 = vld [vmem:[%s2526_s1 + $0x220] ss:$8 sps:$4 sm:$0xff]  }
   0x5   :  { %938 = vmatprep.subr.bf16.mxu0 %v1653_v5  ;;  %v1663_v12 = vld [vmem:[%s2526_s1 + $0x34] ss:$8 sps:$4 sm:$0xff]   ;;  %v1667_v14 = vld [vmem:[%s2526_s1 + $0x30] ss:$8 sps:$4 sm:$0xff]   ;;  %v1669_v16 = vld [vmem:[%s2526_s1 + $0x44] ss:$8 sps:$4 sm:$0xff]  }
   0x6   :  { %v1665_v13 = vld [vmem:[%s2526_s1 + $0x234] ss:$8 sps:$4 sm:$0xff]   ;;  %v1668_v15 = vld [vmem:[%s2526_s1 + $0x230] ss:$8 sps:$4 sm:$0xff]   ;;  %v1671_v17 = vld [vmem:[%s2526_s1 + $0x244] ss:$8 sps:$4 sm:$0xff]  }
   0x7   :  { %857 = vmatpush1.bf16.msra.mxu1 %v1655_v6  ;;  %v1673_v18 = vld [vmem:[%s2526_s1 + $0x40] ss:$8 sps:$4 sm:$0xff]   ;;  %v1675_v20 = vld [vmem:[%s2526_s1 + $0x54] ss:$8 sps:$4 sm:$0xff]   ;;  %v1679_v22 = vld [vmem:[%s2526_s1 + $0x50] ss:$8 sps:$4 sm:$0xff]  }
   0x8   :  { %939 = vmatpush1.bf16.msra.mxu0 %v1656_v7  ;;  %858 = vmatprep.subr.bf16.mxu1 %v1657_v8  ;;  %v1674_v19 = vld [vmem:[%s2526_s1 + $0x240] ss:$8 sps:$4 sm:$0xff]   ;;  %v1677_v21 = vld [vmem:[%s2526_s1 + $0x254] ss:$8 sps:$4 sm:$0xff]   ;;  %v1680_v23 = vld [vmem:[%s2526_s1 + $0x250] ss:$8 sps:$4 sm:$0xff]  }
   0x9   :  { %940 = vmatprep.subr.bf16.mxu0 %v1659_v9  ;;  %v1681_v24 = vld [vmem:[%s2526_s1 + $0x64] ss:$8 sps:$4 sm:$0xff]   ;;  %v1685_v26 = vld [vmem:[%s2526_s1 + $0x60] ss:$8 sps:$4 sm:$0xff]   ;;  %v1687_v28 = vld [vmem:[%s2526_s1 + $0x74] ss:$8 sps:$4 sm:$0xff]  }
   0xa   :  { %v1683_v25 = vld [vmem:[%s2526_s1 + $0x264] ss:$8 sps:$4 sm:$0xff]   ;;  %v1686_v27 = vld [vmem:[%s2526_s1 + $0x260] ss:$8 sps:$4 sm:$0xff]   ;;  %v1689_v29 = vld [vmem:[%s2526_s1 + $0x274] ss:$8 sps:$4 sm:$0xff]  }
   0xb   :  { %859 = vmatpush1.bf16.msra.mxu1 %v1661_v10  ;;  %v1691_v30 = vld [vmem:[%s2526_s1 + $0x70] ss:$8 sps:$4 sm:$0xff]   ;;  %v1693_v32 = vld [vmem:[%s2526_s1 + $0x84] ss:$8 sps:$4 sm:$0xff]   ;;  %v1697_v34 = vld [vmem:[%s2526_s1 + $0x80] ss:$8 sps:$4 sm:$0xff]  }
   0xc   :  { %941 = vmatpush1.bf16.msra.mxu0 %v1662_v11  ;;  %860 = vmatprep.subr.bf16.mxu1 %v1663_v12  ;;  %v1692_v31 = vld [vmem:[%s2526_s1 + $0x270] ss:$8 sps:$4 sm:$0xff]   ;;  %v1695_v33 = vld [vmem:[%s2526_s1 + $0x284] ss:$8 sps:$4 sm:$0xff]   ;;  %v1698_v35 = vld [vmem:[%s2526_s1 + $0x280] ss:$8 sps:$4 sm:$0xff]  }
   0xd   :  { %942 = vmatprep.subr.bf16.mxu0 %v1665_v13  ;;  %v1699_v39 = vld [vmem:[%s2526_s1 + $0x94] ss:$8 sps:$4 sm:$0xff]   ;;  %v1703_v41 = vld [vmem:[%s2526_s1 + $0x90] ss:$8 sps:$4 sm:$0xff]   ;;  %v2030_v43 = vshrl.u32 %v33_v38, 7  ;;  %v25_v52 = vld [vmem:[%s2525_s0] sm:$0xff] }
   0xe   :  { %v1701_v40 = vld [vmem:[%s2526_s1 + $0x294] ss:$8 sps:$4 sm:$0xff]   ;;  %v1704_v44 = vld [vmem:[%s2526_s1 + $0x290] ss:$8 sps:$4 sm:$0xff]   ;;  %v1705_v45 = vld [vmem:[%s2526_s1 + $0xa4] ss:$8 sps:$4 sm:$0xff]   ;;  %v29_v8 = vcombine.high %v25_v52, %v25_v52 }
   0xf   :  { %861 = vmatpush1.bf16.msra.mxu1 %v1667_v14  ;;  %v1707_v46 = vld [vmem:[%s2526_s1 + $0x2a4] ss:$8 sps:$4 sm:$0xff]   ;;  %v1709_v47 = vld [vmem:[%s2526_s1 + $0xa0] ss:$8 sps:$4 sm:$0xff]   ;;  %v2048_v49 = vsub.s32 %v32_v42, %v2030_v43  ;;  %v1711_v50 = vld [vmem:[%s2526_s1 + $0xb4] ss:$8 sps:$4 sm:$0xff]  }
  0x10   :  { %943 = vmatpush1.bf16.msra.mxu0 %v1668_v15  ;;  %862 = vmatprep.subr.bf16.mxu1 %v1669_v16  ;;  %v1710_v48 = vld [vmem:[%s2526_s1 + $0x2a0] ss:$8 sps:$4 sm:$0xff]   ;;  %v1713_v51 = vld [vmem:[%s2526_s1 + $0x2b4] ss:$8 sps:$4 sm:$0xff]   ;;  %v1715_v53 = vld [vmem:[%s2526_s1 + $0xb0] ss:$8 sps:$4 sm:$0xff]  }
  0x11   :  { %944 = vmatprep.subr.bf16.mxu0 %v1671_v17  ;;  %v2063_v54 = vrot.slane %v25_v52, %v2048_v49  ;;  %v1716_v55 = vld [vmem:[%s2526_s1 + $0x2b0] ss:$8 sps:$4 sm:$0xff]   ;;  %v26_v56 = vld [vmem:[%s2525_s0 + $0x8] sm:$0xff]  ;;  %v1723_v1 = vld [vmem:[%s2526_s1 + $0xd4] ss:$8 sps:$4 sm:$0xff]   ;;  %v2117_v14 = vrot.slane %v29_v8, %v2048_v49 }
  0x12   :  { %v1717_v57 = vld [vmem:[%s2526_s1 + $0xc4] ss:$8 sps:$4 sm:$0xff]   ;;  %v53_v60 = vrot.slane %v26_v56, %v2048_v49  ;;  %v1721_v63 = vld [vmem:[%s2526_s1 + $0xc0] ss:$8 sps:$4 sm:$0xff]   ;;  %v1725_v2 = vld [vmem:[%s2526_s1 + $0x2d4] ss:$8 sps:$4 sm:$0xff]   ;;  %v46_v9 = vcombine.high %v26_v56, %v26_v56 }
  0x13   :  { %863 = vmatpush1.bf16.msra.mxu1 %v1673_v18  ;;  %v1719_v58 = vld [vmem:[%s2526_s1 + $0x2c4] ss:$8 sps:$4 sm:$0xff]   ;;  %v44_v59 = vcombine.high %v2063_v54, %v2063_v54  ;;  %v1722_v0 = vld [vmem:[%s2526_s1 + $0x2c0] ss:$8 sps:$4 sm:$0xff]   ;;  %v1727_v4 = vld [vmem:[%s2526_s1 + $0xd0] ss:$8 sps:$4 sm:$0xff]  }
  0x14   :  { %945 = vmatpush1.bf16.msra.mxu0 %v1674_v19  ;;  %864 = vmatprep.subr.bf16.mxu1 %v1675_v20  ;;  %v61_v62 = vcombine.high %v53_v60, %v53_v60  ;;  %v1728_v5 = vld [vmem:[%s2526_s1 + $0x2d0] ss:$8 sps:$4 sm:$0xff]   ;;  %v1729_v6 = vld [vmem:[%s2526_s1 + $0xe4] ss:$8 sps:$4 sm:$0xff]   ;;  %v1733_v10 = vld [vmem:[%s2526_s1 + $0xe0] ss:$8 sps:$4 sm:$0xff]   ;;  %v2120_v15 = vrot.slane %v46_v9, %v2048_v49  ;;  %v45_v20 = vcombine.high %v2117_v14, %v2117_v14 }
  0x15   :  { %946 = vmatprep.subr.bf16.mxu0 %v1677_v21  ;;  %v72_v61 = vpack.c.bf16 %v44_v59, %v44_v59  ;;  %v1731_v7 = vld [vmem:[%s2526_s1 + $0x2e4] ss:$8 sps:$4 sm:$0xff]   ;;  %v1734_v11 = vld [vmem:[%s2526_s1 + $0x2e0] ss:$8 sps:$4 sm:$0xff]   ;;  %v1735_v12 = vld [vmem:[%s2526_s1 + $0xf4] ss:$8 sps:$4 sm:$0xff]  }
  0x16   :  { %v76_v3 = vpack.c.bf16 %v61_v62, %v61_v62  ;;  %v1737_v13 = vld [vmem:[%s2526_s1 + $0x2f4] ss:$8 sps:$4 sm:$0xff]   ;;  %v1739_v16 = vld [vmem:[%s2526_s1 + $0xf0] ss:$8 sps:$4 sm:$0xff]   ;;  %v1744_v18 = vld [vmem:[%s2526_s1 + $0x104] ss:$8 sps:$4 sm:$0xff]   ;;  %v62_v21 = vcombine.high %v2120_v15, %v2120_v15 }
  0x17   :  { %865 = vmatpush1.bf16.msra.mxu1 %v1679_v22  ;;  %886 = vmatprep.mubr.bf16.mxu1 %v72_v61  ;;  %v1740_v17 = vld [vmem:[%s2526_s1 + $0x2f0] ss:$8 sps:$4 sm:$0xff]   ;;  %v1748_v19 = vld [vmem:[%s2526_s1 + $0x304] ss:$8 sps:$4 sm:$0xff]   ;;  %v71_v22 = vpack.c.bf16 %v2063_v54, %v2063_v54  ;;  %v1763_v36 = vld [vmem:[%s2526_s1 + $0x134] ss:$8 sps:$4 sm:$0xff]  }
  0x18   :  { %947 = vmatpush1.bf16.msra.mxu0 %v1680_v23  ;;  %866 = vmatprep.subr.bf16.mxu1 %v1681_v24  ;;  %v75_v23 = vpack.c.bf16 %v53_v60, %v53_v60  ;;  %v1742_v24 = vld [vmem:[%s2526_s1 + $0x100] ss:$8 sps:$4 sm:$0xff]   ;;  %v1766_v37 = vld [vmem:[%s2526_s1 + $0x334] ss:$8 sps:$4 sm:$0xff]   ;;  %v1772_v42 = vld [vmem:[%s2526_s1 + $0x344] ss:$8 sps:$4 sm:$0xff]  }
  0x19   :  { %948 = vmatprep.subr.bf16.mxu0 %v1683_v25  ;;  %968 = vmatprep.mubr.bf16.mxu0 %v76_v3  ;;  %v1746_v25 = vld [vmem:[%s2526_s1 + $0x300] ss:$8 sps:$4 sm:$0xff]   ;;  %v1784_v52 = vld [vmem:[%s2526_s1 + $0x364] ss:$8 sps:$4 sm:$0xff]  }
  0x1b   :  { %867 = vmatpush1.bf16.msra.mxu1 %v1685_v26  ;;  %v1751_v26 = vld [vmem:[%s2526_s1 + $0x114] ss:$8 sps:$4 sm:$0xff]  }
  0x1c   :  { %949 = vmatpush1.bf16.msra.mxu0 %v1686_v27  ;;  %868 = vmatprep.subr.bf16.mxu1 %v1687_v28  ;;  %v1754_v27 = vld [vmem:[%s2526_s1 + $0x314] ss:$8 sps:$4 sm:$0xff]   ;;  %v74_v28 = vpack.c.bf16 %v45_v20, %v45_v20 }
  0x1d   :  { %950 = vmatprep.subr.bf16.mxu0 %v1689_v29  ;;  %v78_v29 = vpack.c.bf16 %v62_v21, %v62_v21 }
  0x1f   :  { %869 = vmatpush1.bf16.msra.mxu1 %v1691_v30  ;;  %v1749_v30 = vld [vmem:[%s2526_s1 + $0x110] ss:$8 sps:$4 sm:$0xff]  }
  0x20   :  { %951 = vmatpush1.bf16.msra.mxu0 %v1692_v31  ;;  %870 = vmatprep.subr.bf16.mxu1 %v1693_v32  ;;  %v1752_v31 = vld [vmem:[%s2526_s1 + $0x310] ss:$8 sps:$4 sm:$0xff]   ;;  %v1757_v32 = vld [vmem:[%s2526_s1 + $0x124] ss:$8 sps:$4 sm:$0xff]  }
  0x21   :  { %952 = vmatprep.subr.bf16.mxu0 %v1695_v33  ;;  %v1760_v33 = vld [vmem:[%s2526_s1 + $0x324] ss:$8 sps:$4 sm:$0xff]  }
  0x23   :  { %871 = vmatpush1.bf16.msra.mxu1 %v1697_v34  ;;  %v1755_v34 = vld [vmem:[%s2526_s1 + $0x120] ss:$8 sps:$4 sm:$0xff]  }
  0x24   :  { %953 = vmatpush1.bf16.msra.mxu0 %v1698_v35  ;;  %872 = vmatprep.subr.bf16.mxu1 %v1699_v39  ;;  %v1758_v35 = vld [vmem:[%s2526_s1 + $0x320] ss:$8 sps:$4 sm:$0xff]   ;;  %v1761_v39 = vld [vmem:[%s2526_s1 + $0x130] ss:$8 sps:$4 sm:$0xff]  }
  0x25   :  { %954 = vmatprep.subr.bf16.mxu0 %v1701_v40  ;;  %v1764_v40 = vld [vmem:[%s2526_s1 + $0x330] ss:$8 sps:$4 sm:$0xff]  }
  0x27   :  { %873 = vmatpush1.bf16.msra.mxu1 %v1703_v41  ;;  %v1769_v41 = vld [vmem:[%s2526_s1 + $0x144] ss:$8 sps:$4 sm:$0xff]  }
  0x28   :  { %955 = vmatpush1.bf16.msra.mxu0 %v1704_v44  ;;  %874 = vmatprep.subr.bf16.mxu1 %v1705_v45  ;;  %v1767_v44 = vld [vmem:[%s2526_s1 + $0x140] ss:$8 sps:$4 sm:$0xff]  }
  0x29   :  { %956 = vmatprep.subr.bf16.mxu0 %v1707_v46  ;;  %v1770_v45 = vld [vmem:[%s2526_s1 + $0x340] ss:$8 sps:$4 sm:$0xff]   ;;  %v1775_v46 = vld [vmem:[%s2526_s1 + $0x154] ss:$8 sps:$4 sm:$0xff]  }
  0x2b   :  { %875 = vmatpush1.bf16.msra.mxu1 %v1709_v47  ;;  %v1778_v47 = vld [vmem:[%s2526_s1 + $0x354] ss:$8 sps:$4 sm:$0xff]  }
  0x2c   :  { %957 = vmatpush1.bf16.msra.mxu0 %v1710_v48  ;;  %876 = vmatprep.subr.bf16.mxu1 %v1711_v50  ;;  %v1773_v48 = vld [vmem:[%s2526_s1 + $0x150] ss:$8 sps:$4 sm:$0xff]  }
  0x2d   :  { %958 = vmatprep.subr.bf16.mxu0 %v1713_v51  ;;  %v1776_v50 = vld [vmem:[%s2526_s1 + $0x350] ss:$8 sps:$4 sm:$0xff]   ;;  %v1781_v51 = vld [vmem:[%s2526_s1 + $0x164] ss:$8 sps:$4 sm:$0xff]  }
  0x2f   :  { %877 = vmatpush1.bf16.msra.mxu1 %v1715_v53 }
  0x30   :  { %959 = vmatpush1.bf16.msra.mxu0 %v1716_v55  ;;  %878 = vmatprep.subr.bf16.mxu1 %v1717_v57 }
  0x31   :  { %960 = vmatprep.subr.bf16.mxu0 %v1719_v58 }
  0x33   :  { %879 = vmatpush1.bf16.msra.mxu1 %v1721_v63 }
  0x34   :  { %961 = vmatpush1.bf16.msra.mxu0 %v1722_v0  ;;  %880 = vmatprep.subr.bf16.mxu1 %v1723_v1 }
  0x35   :  { %962 = vmatprep.subr.bf16.mxu0 %v1725_v2 }
  0x37   :  { %881 = vmatpush1.bf16.msra.mxu1 %v1727_v4 }
  0x38   :  { %963 = vmatpush1.bf16.msra.mxu0 %v1728_v5  ;;  %882 = vmatprep.subr.bf16.mxu1 %v1729_v6 }
  0x39   :  { %964 = vmatprep.subr.bf16.mxu0 %v1731_v7 }
  0x3b   :  { %883 = vmatpush1.bf16.msra.mxu1 %v1733_v10 }
  0x3c   :  { %965 = vmatpush1.bf16.msra.mxu0 %v1734_v11  ;;  %884 = vmatprep.subr.bf16.mxu1 %v1735_v12 }
  0x3d   :  { %966 = vmatprep.subr.bf16.mxu0 %v1737_v13 }
  0x3f   :  { %885 = vmatpush1.bf16.msra.mxu1 %v1739_v16 }
  0x40   :  { %967 = vmatpush1.bf16.msra.mxu0 %v1740_v17  ;;  %895 = vmatprep.subr.bf16.mxu1 %v1744_v18 }
  0x41   :  { %977 = vmatprep.subr.bf16.mxu0 %v1748_v19 }
  0x42   :  { %887 = vmatmul.mubr.bf16.vlgmr.msra.gmra.mrb[0].mxu1 %v71_v22 }
  0x43   :  { %969 = vmatmul.mubr.bf16.vlgmr.msra.gmra.mrb[0].mxu0 %v75_v23  ;;  %896 = vmatpush1.bf16.msra.mxu1 %v1742_v24 }
  0x44   :  { %978 = vmatpush1.bf16.msra.mxu0 %v1746_v25  ;;  %897 = vmatprep.subr.bf16.mxu1 %v1751_v26 }
  0x45   :  { %979 = vmatprep.subr.bf16.mxu0 %v1754_v27  ;;  %927 = vmatprep.mubr.bf16.mxu1 %v74_v28 }
  0x46   :  { %1009 = vmatprep.mubr.bf16.mxu0 %v78_v29 }
  0x47   :  { %898 = vmatpush1.bf16.msra.mxu1 %v1749_v30 }
  0x48   :  { %980 = vmatpush1.bf16.msra.mxu0 %v1752_v31  ;;  %899 = vmatprep.subr.bf16.mxu1 %v1757_v32 }
  0x49   :  { %981 = vmatprep.subr.bf16.mxu0 %v1760_v33 }
  0x4b   :  { %900 = vmatpush1.bf16.msra.mxu1 %v1755_v34 }
  0x4c   :  { %982 = vmatpush1.bf16.msra.mxu0 %v1758_v35  ;;  %901 = vmatprep.subr.bf16.mxu1 %v1763_v36 }
  0x4d   :  { %983 = vmatprep.subr.bf16.mxu0 %v1766_v37 }
  0x4f   :  { %902 = vmatpush1.bf16.msra.mxu1 %v1761_v39 }
  0x50   :  { %984 = vmatpush1.bf16.msra.mxu0 %v1764_v40  ;;  %903 = vmatprep.subr.bf16.mxu1 %v1769_v41 }
  0x51   :  { %985 = vmatprep.subr.bf16.mxu0 %v1772_v42 }
  0x53   :  { %904 = vmatpush1.bf16.msra.mxu1 %v1767_v44 }
  0x54   :  { %986 = vmatpush1.bf16.msra.mxu0 %v1770_v45  ;;  %905 = vmatprep.subr.bf16.mxu1 %v1775_v46 }
  0x55   :  { %987 = vmatprep.subr.bf16.mxu0 %v1778_v47 }
  0x56   :  { %11 = vsyncpa [#allocation3], 0  ;;  %v1779_v53 = vld [vmem:[%s2526_s1 + $0x160] ss:$8 sps:$4 sm:$0xff]   ;;  %v1787_v55 = vld [vmem:[%s2526_s1 + $0x174] ss:$8 sps:$4 sm:$0xff]   ;;  %v73_v29 = vpack.c.bf16 %v2117_v14, %v2117_v14  ;;  %v77_v30 = vpack.c.bf16 %v2120_v15, %v2120_v15 }
  0x57   :  { %906 = vmatpush1.bf16.msra.mxu1 %v1773_v48  ;;  %v1782_v54 = vld [vmem:[%s2526_s1 + $0x360] ss:$8 sps:$4 sm:$0xff]   ;;  %v1790_v56 = vld [vmem:[%s2526_s1 + $0x374] ss:$8 sps:$4 sm:$0xff]   ;;  %v1785_v57 = vld [vmem:[%s2526_s1 + $0x170] ss:$8 sps:$4 sm:$0xff]  }
  0x58   :  { %988 = vmatpush1.bf16.msra.mxu0 %v1776_v50  ;;  %907 = vmatprep.subr.bf16.mxu1 %v1781_v51  ;;  %v1788_v58 = vld [vmem:[%s2526_s1 + $0x370] ss:$8 sps:$4 sm:$0xff]   ;;  %v1793_v59 = vld [vmem:[%s2526_s1 + $0x184] ss:$8 sps:$4 sm:$0xff]   ;;  %v1791_v61 = vld [vmem:[%s2526_s1 + $0x180] ss:$8 sps:$4 sm:$0xff]  }
  0x59   :  { %989 = vmatprep.subr.bf16.mxu0 %v1784_v52  ;;  %v1796_v60 = vld [vmem:[%s2526_s1 + $0x384] ss:$8 sps:$4 sm:$0xff]   ;;  %v1794_v62 = vld [vmem:[%s2526_s1 + $0x380] ss:$8 sps:$4 sm:$0xff]   ;;  %v1799_v63 = vld [vmem:[%s2526_s1 + $0x194] ss:$8 sps:$4 sm:$0xff]  }
  0x5a   :  { %v1802_v0 = vld [vmem:[%s2526_s1 + $0x394] ss:$8 sps:$4 sm:$0xff]   ;;  %v1797_v1 = vld [vmem:[%s2526_s1 + $0x190] ss:$8 sps:$4 sm:$0xff]   ;;  %v1805_v3 = vld [vmem:[%s2526_s1 + $0x1a4] ss:$8 sps:$4 sm:$0xff]  }
  0x5b   :  { %908 = vmatpush1.bf16.msra.mxu1 %v1779_v53  ;;  %v1800_v2 = vld [vmem:[%s2526_s1 + $0x390] ss:$8 sps:$4 sm:$0xff]   ;;  %v1808_v4 = vld [vmem:[%s2526_s1 + $0x3a4] ss:$8 sps:$4 sm:$0xff]   ;;  %v1803_v5 = vld [vmem:[%s2526_s1 + $0x1a0] ss:$8 sps:$4 sm:$0xff]  }
  0x5c   :  { %990 = vmatpush1.bf16.msra.mxu0 %v1782_v54  ;;  %909 = vmatprep.subr.bf16.mxu1 %v1787_v55  ;;  %v1806_v6 = vld [vmem:[%s2526_s1 + $0x3a0] ss:$8 sps:$4 sm:$0xff]   ;;  %v1811_v7 = vld [vmem:[%s2526_s1 + $0x1b4] ss:$8 sps:$4 sm:$0xff]   ;;  %v1809_v9 = vld [vmem:[%s2526_s1 + $0x1b0] ss:$8 sps:$4 sm:$0xff]  }
  0x5d   :  { %991 = vmatprep.subr.bf16.mxu0 %v1790_v56  ;;  %v1814_v8 = vld [vmem:[%s2526_s1 + $0x3b4] ss:$8 sps:$4 sm:$0xff]   ;;  %v1812_v10 = vld [vmem:[%s2526_s1 + $0x3b0] ss:$8 sps:$4 sm:$0xff]   ;;  %v1817_v11 = vld [vmem:[%s2526_s1 + $0x1c4] ss:$8 sps:$4 sm:$0xff]  }
  0x5e   :  { %v1820_v12 = vld [vmem:[%s2526_s1 + $0x3c4] ss:$8 sps:$4 sm:$0xff]   ;;  %v1815_v13 = vld [vmem:[%s2526_s1 + $0x1c0] ss:$8 sps:$4 sm:$0xff]   ;;  %v1823_v17 = vld [vmem:[%s2526_s1 + $0x1d4] ss:$8 sps:$4 sm:$0xff]  }
  0x5f   :  { %910 = vmatpush1.bf16.msra.mxu1 %v1785_v57  ;;  %v1818_v16 = vld [vmem:[%s2526_s1 + $0x3c0] ss:$8 sps:$4 sm:$0xff]   ;;  %v1826_v18 = vld [vmem:[%s2526_s1 + $0x3d4] ss:$8 sps:$4 sm:$0xff]   ;;  %v1821_v19 = vld [vmem:[%s2526_s1 + $0x1d0] ss:$8 sps:$4 sm:$0xff]  }
  0x60   :  { %992 = vmatpush1.bf16.msra.mxu0 %v1788_v58  ;;  %911 = vmatprep.subr.bf16.mxu1 %v1793_v59  ;;  %v1824_v20 = vld [vmem:[%s2526_s1 + $0x3d0] ss:$8 sps:$4 sm:$0xff]   ;;  %v1829_v21 = vld [vmem:[%s2526_s1 + $0x1e4] ss:$8 sps:$4 sm:$0xff]   ;;  %v1827_v23 = vld [vmem:[%s2526_s1 + $0x1e0] ss:$8 sps:$4 sm:$0xff]  }
  0x61   :  { %993 = vmatprep.subr.bf16.mxu0 %v1796_v60  ;;  %v1832_v22 = vld [vmem:[%s2526_s1 + $0x3e4] ss:$8 sps:$4 sm:$0xff]   ;;  %v1830_v24 = vld [vmem:[%s2526_s1 + $0x3e0] ss:$8 sps:$4 sm:$0xff]   ;;  %v1835_v25 = vld [vmem:[%s2526_s1 + $0x1f4] ss:$8 sps:$4 sm:$0xff]  }
  0x62   :  { %v1838_v26 = vld [vmem:[%s2526_s1 + $0x3f4] ss:$8 sps:$4 sm:$0xff]   ;;  %v1833_v27 = vld [vmem:[%s2526_s1 + $0x1f0] ss:$8 sps:$4 sm:$0xff]   ;;  %v1872_v31 = vmov 0.0   ;;  %v1873_v32 = vmov 0  }
  0x63   :  { %912 = vmatpush1.bf16.msra.mxu1 %v1791_v61  ;;  %v1836_v28 = vld [vmem:[%s2526_s1 + $0x3f0] ss:$8 sps:$4 sm:$0xff]   ;;  %24 = vst [vmem:[#allocation2] sm:$0xf] %v1872_v31  ;;  %1641 = vset.pattern.permute.xlu0 %v1873_v32  ;;  %v1039_v14 = vsub.s32 0, %v2030_v43  ;;  %v1043_v15 = vsub.s32 1, %v2030_v43 }
  0x64   :  { %994 = vmatpush1.bf16.msra.mxu0 %v1794_v62  ;;  %913 = vmatprep.subr.bf16.mxu1 %v1799_v63  ;;  %v1035_v42 = vld [vmem:[%s2527_s2] sm:$0x3]  ;;  %v2339_v53 = vand.u32 127, %v33_v38  ;;  %vm1097_vm7 = vcmask 1041408   ;;  %v1874_v62 = vmov -inf   ;;  %s1880_s23 = smov 126  }
  0x65   :  { %995 = vmatprep.subr.bf16.mxu0 %v1802_v0  ;;  %v1040_v50 = vrot.slane %v1035_v42, %v1039_v14  ;;  %v1044_v51 = vrot.slane %v1035_v42, %v1043_v15  ;;  %v1105_v63 = vsel %vm1097_vm7, -1e+30, %v1874_v62  ;;  %s1881_s24 = smov [#allocation2]  }
  0x66   :  { %v2342_v55 = vadd.s32 128, %v2339_v53  ;;  %s1461_s25 = sshll.u32 %s1881_s24, 4  ;;  %s1462_s25 = int_to_ptr.vmem [resolvable:$true] %s1461_s25 }
  0x67   :  { %914 = vmatpush1.bf16.msra.mxu1 %v1797_v1  ;;  %v1045_v54 = vcombine.low %v1040_v50, %v1044_v51  ;;  %s1847_s26 = scalar_lea.vmem %s1462_s25, 64  ;;  %p1852_p1 = scmp.lt.s32.totalorder %s1462_s25, %s1462_s25 }
  0x68   :  { %996 = vmatpush1.bf16.msra.mxu0 %v1800_v2  ;;  %915 = vmatprep.subr.bf16.mxu1 %v1805_v3  ;;  %vm1073_vm0 = vcmp.ge.s32.totalorder %v2342_v55, 168  ;;  %vm1075_vm1 = vcmp.lt.s32.totalorder %v2342_v55, 179  ;;  %vm1079_vm2 = vcmp.ge.s32.totalorder %v2342_v55, 179  ;;  %vm1081_vm3 = vcmp.lt.s32.totalorder %v2342_v55, 186  ;;  %p1848_p0 = scmp.ne.s32.totalorder %s1462_s25, %s1847_s26  ;;  %p1853_p2 = scmp.lt.s32.totalorder %s1847_s26, %s1847_s26 }
  0x69   :  { %997 = vmatprep.subr.bf16.mxu0 %v1808_v4  ;;  %v1052_v56 = vrot.slane %v1045_v54, %v2048_v49  ;;  %vm2352_vm4 = vmand %vm1073_vm0, %vm1075_vm1  ;;  %vm1069_vm5 = vcmp.lt.s32.totalorder %v2342_v55, 168 }
  0x6a   :  { %v213_v47 = vld [vmem:[#allocation2] sm:$0xf]  ;;  %vm2361_vm6 = vmand %vm1079_vm2, %vm1081_vm3  ;;  %p1854_p3 = por %p1853_p2, %p1852_p1 }
  0x6b   :  { %916 = vmatpush1.bf16.msra.mxu1 %v1803_v5 }
  0x6c   :  { %998 = vmatpush1.bf16.msra.mxu0 %v1806_v6  ;;  %917 = vmatprep.subr.bf16.mxu1 %v1811_v7  ;;  %p1855_p4 = pnand %p1854_p3, %p1848_p0 }
  0x6d   :  { %999 = vmatprep.subr.bf16.mxu0 %v1814_v8 }
  0x6f   :  { %918 = vmatpush1.bf16.msra.mxu1 %v1809_v9 }
  0x70   :  { %1000 = vmatpush1.bf16.msra.mxu0 %v1812_v10  ;;  %919 = vmatprep.subr.bf16.mxu1 %v1817_v11  ;;  %v1875_v10 = vmov 1   ;;  %v1876_v11 = vmov 269488144  }
  0x71   :  { %1001 = vmatprep.subr.bf16.mxu0 %v1820_v12  ;;  %1642 = vset.pattern.permute.xlu1 %v1875_v10  ;;  %v1185_v12 = vunpack.c.l.s4 %v1876_v11 }
  0x73   :  { %920 = vmatpush1.bf16.msra.mxu1 %v1815_v13  ;;  %v1186_v13 = vunpack.c.0.s8 %v1185_v12 }
  0x74   :  { %1002 = vmatpush1.bf16.msra.mxu0 %v1818_v16  ;;  %921 = vmatprep.subr.bf16.mxu1 %v1823_v17 }
  0x75   :  { %1003 = vmatprep.subr.bf16.mxu0 %v1826_v18  ;;  %v1189_v16 = vsub.s32 %v1186_v13, %v2030_v43 }
  0x77   :  { %922 = vmatpush1.bf16.msra.mxu1 %v1821_v19 }
  0x78   :  { %1004 = vmatpush1.bf16.msra.mxu0 %v1824_v20  ;;  %923 = vmatprep.subr.bf16.mxu1 %v1829_v21 }
  0x79   :  { %1005 = vmatprep.subr.bf16.mxu0 %v1832_v22 }
  0x7b   :  { %924 = vmatpush1.bf16.msra.mxu1 %v1827_v23 }
  0x7c   :  { %1006 = vmatpush1.bf16.msra.mxu0 %v1830_v24  ;;  %925 = vmatprep.subr.bf16.mxu1 %v1835_v25 }
  0x7d   :  { %1007 = vmatprep.subr.bf16.mxu0 %v1838_v26  ;;  %v1877_v26 = vmov 2147483647  }
  0x7f   :  { %926 = vmatpush1.bf16.msra.mxu1 %v1833_v27  ;;  %v1300_v27 = vsel %vm1097_vm7, 256, %v1877_v26 }
  0x80   :  { %1008 = vmatpush1.bf16.msra.mxu0 %v1836_v28 }
  0x82   :  { %928 = vmatmul.mubr.bf16.vlgmr.msra.gmra.mrb[0].mxu1 %v73_v29 }
  0x83   :  { %1010 = vmatmul.mubr.bf16.vlgmr.msra.gmra.mrb[0].mxu0 %v77_v30 }
 0x155   :  { %v929_v33 = vpop.f32.mrb[0].mxu1 }
 0x156   :  { %v1011_v34 = vpop.f32.mrb[0].mxu0  ;;  %v931_v36 = vpop.f32.mrb[1].mxu1 }
 0x157   :  { %v1608_v35 = vadd.f32 %v1011_v34, %v929_v33  ;;  %v1013_v37 = vpop.f32.mrb[1].mxu0  ;;  %v933_v40 = vpop.f32.mrb[2].mxu1 }
 0x158   :  { %v1609_v39 = vadd.f32 %v1013_v37, %v931_v36  ;;  %v1015_v41 = vpop.f32.mrb[2].mxu0  ;;  %v934_v44 = vpop.f32.mrb[3].mxu1 }
 0x159   :  { %v1016_v45 = vpop.f32.mrb[3].mxu0  ;;  %v2411_v41 = vld [vmem:[%s2528_s3] sm:$0x3]  ;;  %s1879_s3 = smov 127  }
 0x15a   :  { %v1020_v46 = vcombine.low %v1608_v35, %v1609_v39  ;;  %v1250_v44 = vadd.s32 168, %v2411_v41  ;;  %v1347_v62 = vadd.s32 179, %v2411_v41 }
 0x15c   :  { %v1027_v48 = vrot.slane %v1020_v46, %v2048_v49 }
 0x15e   :  { %v1029_v52 = vadd.f32 %v1027_v48, %v213_v47  ;;  %v1878_v47 = vmov 2  }
 0x160   :  { %1030 = vst [vmem:[#allocation2] sm:$0xf] %v1029_v52 }
 0x167   :  { %v1034_v57 = vld [vmem:[#allocation2] sm:$0xf] }
 0x168   :  { %v2347_v58 = vadd.f32 %v1052_v56, %v1034_v57 }
 0x16a   :  { %1055 = vst [vmem:[#allocation2] sm:$0xf] %v2347_v58  ;;  %v2358_v59 = vrot.slane %v2347_v58, %v2048_v49 }
 0x16c   :  { %v2367_v61 = vcombine.high %v2358_v59, %v2358_v59  ;;  %v1098_v4 = vsel %vm1097_vm7, %v2358_v59, -inf }
 0x16e   :  { %v1104_v0 = vsel %vm2352_vm4, %v2367_v61, -1e+30  ;;  %v1096_v1 = vsel %vm1069_vm5, %v2367_v61, -1e+30  ;;  %v1111_v2 = vsel %vm2361_vm6, %v2367_v61, -1e+30 }
 0x16f   :  { %v1106_v3 = vsel %vm1097_vm7, %v1104_v0, -inf  ;;  %v1099_v5 = vsel %vm1097_vm7, %v1096_v1, -inf  ;;  %v1113_v8 = vsel %vm1097_vm7, %v1111_v2, -inf }
 0x170   :  { %v1107_v6 = vmax.f32 %v1105_v63, %v1106_v3  ;;  %v1100_v7 = vmax.f32 %v1098_v4, %v1099_v5  ;;  %v1114_v9 = vmax.f32 %v1105_v63, %v1113_v8 }
 0x172   :  { %1108 = vmax.xlane.f32.xlu0 %v1107_v6  ;;  %1101 = vmax.xlane.f32.xlu1 %v1100_v7 }
 0x176   :  { %1115 = vmax.xlane.f32.xlu0 %v1114_v9 }
 0x1ff   :  { %v2385_v17 = vpop.xlane.xlu0 %1108  ;;  %v2406_v40 = vpop.xlane.xlu1 %1101 }
 0x200   :  { %v1282_v18 = vrot.slane %v2385_v17, %v1189_v16  ;;  %v1190_v42 = vrot.slane %v2406_v40, %v1189_v16 }
 0x202   :  { %vm1284_vm8 = vcmp.eq.f32.partialorder %v2347_v58, %v1282_v18  ;;  %vm1192_vm0 = vcmp.eq.f32.partialorder %v2347_v58, %v1190_v42 }
 0x203   :  { %v1285_v19 = vsel %vm1284_vm8, 1, %v1873_v32  ;;  %v2390_v20 = vpop.xlane.xlu0 %1115  ;;  %v1193_v45 = vsel %vm1192_vm0, 1, %v1873_v32 }
 0x204   :  { %v1292_v21 = vrot.slane %v1285_v19, %v2048_v49  ;;  %v1379_v22 = vrot.slane %v2390_v20, %v1189_v16  ;;  %v1200_v46 = vrot.slane %v1193_v45, %v2048_v49  ;;  %v1118_v63 = vsel %vm2361_vm6, %v2390_v20, 0.0 }
 0x205   :  { %v1120_v0 = vsel %vm2352_vm4, %v2385_v17, %v1118_v63 }
 0x206   :  { %v1293_v23 = vcombine.high %v1292_v21, %v1292_v21  ;;  %vm1381_vm9 = vcmp.eq.f32.partialorder %v2347_v58, %v1379_v22  ;;  %v1201_v48 = vcombine.high %v1200_v46, %v1200_v46  ;;  %vm1202_vm3 = vcmp.ne.s32.totalorder %v1200_v46, 0 }
 0x207   :  { %v1382_v24 = vsel %vm1381_vm9, 1, %v1873_v32  ;;  %v1206_v51 = vsel %vm1202_vm3, %v2339_v53, 256  ;;  %v1122_v1 = vsel %vm1069_vm5, %v2406_v40, %v1120_v0  ;;  %vm1172_vm3 = vcmask 1024  }
 0x208   :  { %v1389_v25 = vrot.slane %v1382_v24, %v2048_v49  ;;  %vm1295_vm10 = vcmp.ne.s32.totalorder %v1293_v23, 0  ;;  %vm1203_vm1 = vcmp.ne.s32.totalorder %v1201_v48, 0  ;;  %v1208_v32 = vsel %vm1097_vm7, %v1206_v51, 2147483647 }
 0x209   :  { %vm1297_vm11 = vmand %vm2352_vm4, %vm1295_vm10  ;;  %v1125_v2 = vcombine.low %v2406_v40, %v1122_v1 }
 0x20a   :  { %v1390_v28 = vcombine.high %v1389_v25, %v1389_v25  ;;  %v1299_v29 = vsel %vm1297_vm11, %v2342_v55, 256  ;;  %vm1205_vm2 = vmand %vm1069_vm5, %vm1203_vm1 }
 0x20b   :  { %v1301_v30 = vsel %vm1097_vm7, %v1299_v29, 2147483647  ;;  %v1207_v50 = vsel %vm1205_vm2, %v2342_v55, 256  ;;  %v1132_v3 = vrot.slane %v1125_v2, %v2048_v49 }
 0x20c   :  { %vm1302_vm12 = vcmp.lt.s32.totalorder %v1300_v27, %v1301_v30  ;;  %vm1392_vm13 = vcmp.ne.s32.totalorder %v1390_v28, 0  ;;  %v1209_v52 = vsel %vm1097_vm7, %v1207_v50, 2147483647 }
 0x20d   :  { %v1303_v33 = vsel %vm1302_vm12, %v1300_v27, %v1301_v30  ;;  %vm1394_vm14 = vmand %vm2361_vm6, %vm1392_vm13  ;;  %vm1210_vm8 = vcmp.lt.s32.totalorder %v1208_v32, %v1209_v52  ;;  %v1134_v4 = vsub.f32 %v2347_v58, %v1132_v3 }
 0x20e   :  { %v1305_v34 = vshra.s32 %v1303_v33, 16  ;;  %v1396_v35 = vsel %vm1394_vm14, %v2342_v55, 256  ;;  %v2425_v54 = vsel %vm1210_vm8, %v1208_v32, %v1209_v52  ;;  %v1304_v9 = vand.u32 65535, %v1303_v33 }
 0x20f   :  { %v1398_v36 = vsel %vm1097_vm7, %v1396_v35, 2147483647  ;;  %v1213_v56 = vshra.s32 %v2425_v54, 16  ;;  %v1135_v5 = vmul.f32 1.442695, %v1134_v4 }
 0x210   :  { %v1307_v37 = vcvt.s32.f32 %v1305_v34  ;;  %vm1399_vm15 = vcmp.lt.s32.totalorder %v1300_v27, %v1398_v36  ;;  %v1306_v12 = vcvt.s32.f32 %v1304_v9 }
 0x211   :  { %v1400_v39 = vsel %vm1399_vm15, %v1300_v27, %v1398_v36  ;;  %v2428_v57 = vcvt.s32.f32 %v1213_v56  ;;  %1839 = vpow2.f32 %v1135_v5 }
 0x212   :  { %1308 = vmin.xlane.f32.xlu1 %v1307_v37  ;;  %v1402_v14 = vshra.s32 %v1400_v39, 16  ;;  %v1401_v13 = vand.u32 65535, %v1400_v39 }
 0x214   :  { %v1404_v15 = vcvt.s32.f32 %v1402_v14  ;;  %v1403_v21 = vcvt.s32.f32 %v1401_v13 }
 0x216   :  { %1405 = vmin.xlane.f32.xlu0 %v1404_v15 }
 0x21b   :  { %v1840_v6 = vpop.eup %1839 }
 0x21c   :  { %v1144_v7 = vrot.slane %v1840_v6, %v2048_v49 }
 0x21e   :  { %v1145_v8 = vcombine.high %v1144_v7, %v1144_v7  ;;  %v1150_v22 = vsel %vm1097_vm7, %v1144_v7, 0.0 }
 0x220   :  { %v1149_v10 = vsel %vm1069_vm5, %v1145_v8, 0.0  ;;  %v1241_v26 = vsel %vm2352_vm4, %v1145_v8, 0.0  ;;  %v1338_v33 = vsel %vm2361_vm6, %v1145_v8, 0.0 }
 0x221   :  { %v1151_v18 = vsel %vm1097_vm7, %v1149_v10, 0.0  ;;  %v1243_v30 = vsel %vm1097_vm7, %v1241_v26, 0.0  ;;  %v1340_v36 = vsel %vm1097_vm7, %v1338_v33, 0.0 }
 0x222   :  { %v1152_v49 = vadd.f32 %v1151_v18, %v1150_v22 }
 0x223   :  { %1252 = vperm.xlu1 %1642, %v1250_v44  }
 0x227   :  { %1643 = vset.pattern.permute.xlu1 %v1878_v47 }
 0x22c   :  { %1159 = vperm.xlu0 %1641, %v2411_v41  }
 0x230   :  { %1644 = vset.pattern.permute.xlu0 %v1878_v47  ;;  %v1212_v47 = vand.u32 65535, %v2425_v54 }
 0x232   :  { %v1214_v50 = vcvt.s32.f32 %v1212_v47 }
 0x247   :  { %1216 = vmin.xlane.f32.xlu1 %v2428_v57 }
 0x258   :  { %1349 = vperm.xlu1 %1643, %v1347_v62  }
 0x29f   :  { %v1309_v11 = vpop.xlane.xlu1 %1308 }
 0x2a0   :  { %vm1310_vm9 = vcmp.eq.f32.partialorder %v1307_v37, %v1309_v11  ;;  %v1315_v52 = vcvt.f32.s32 %v1309_v11 }
 0x2a1   :  { %v1311_v16 = vsel %vm1310_vm9, %v1306_v12, inf }
 0x2a2   :  { %1312 = vmin.xlane.f32.xlu1 %v1311_v16 }
 0x2a3   :  { %v1406_v19 = vpop.xlane.xlu0 %1405  ;;  %v1253_v58 = vpop.permute.xlu1 %1252 }
 0x2a4   :  { %vm1254_vm10 = vcmp.eq.s32.totalorder %v2339_v53, %v1253_v58  ;;  %vm1255_vm11 = vcmp.eq.s32.totalorder %v2342_v55, %v1253_v58  ;;  %vm1407_vm12 = vcmp.eq.f32.partialorder %v1404_v15, %v1406_v19  ;;  %v1412_v56 = vcvt.f32.s32 %v1406_v19 }
 0x2a5   :  { %v1256_v23 = vsel %vm1254_vm10, %v2358_v59, 0.0  ;;  %v1257_v24 = vsel %vm1255_vm11, %v2367_v61, 0.0  ;;  %v1408_v25 = vsel %vm1407_vm12, %v1403_v21, inf }
 0x2a6   :  { %1409 = vmin.xlane.f32.xlu0 %v1408_v25  ;;  %1153 = vadd.xlane.f32.xlu1 %v1152_v49  ;;  %v1258_v27 = vsel %vm1097_vm7, %v1256_v23, 0.0  ;;  %v1259_v28 = vsel %vm1097_vm7, %v1257_v24, 0.0  ;;  %v1413_v63 = vshll.u32 %v1412_v56, 16 }
 0x2a7   :  { %v1260_v29 = vadd.f32 %v1259_v28, %v1258_v27 }
 0x2aa   :  { %1245 = vadd.xlane.f32.xlu1 %v1243_v30  ;;  %1261 = vadd.xlane.f32.xlu0 %v1260_v29 }
 0x2ab   :  { %v1160_v34 = vpop.permute.xlu0 %1159 }
 0x2ac   :  { %vm1161_vm5 = vcmp.eq.s32.totalorder %v2339_v53, %v1160_v34  ;;  %vm1162_vm13 = vcmp.eq.s32.totalorder %v2342_v55, %v1160_v34 }
 0x2ad   :  { %v1163_v38 = vsel %vm1161_vm5, %v2358_v59, 0.0  ;;  %v1164_v35 = vsel %vm1162_vm13, %v2367_v61, 0.0 }
 0x2ae   :  { %1342 = vadd.xlane.f32.xlu1 %v1340_v36  ;;  %v1165_v37 = vsel %vm1097_vm7, %v1163_v38, 0.0  ;;  %v1166_v39 = vsel %vm1097_vm7, %v1164_v35, 0.0 }
 0x2af   :  { %v1167_v14 = vadd.f32 %v1166_v39, %v1165_v37 }
 0x2b2   :  { %1168 = vadd.xlane.f32.xlu1 %v1167_v14 }
 0x2d4   :  { %v1217_v60 = vpop.xlane.xlu1 %1216 }
 0x2d5   :  { %vm1218_vm14 = vcmp.eq.f32.partialorder %v2428_v57, %v1217_v60  ;;  %v1223_v19 = vcvt.f32.s32 %v1217_v60 }
 0x2d6   :  { %v1219_v51 = vsel %vm1218_vm14, %v1214_v50, inf }
 0x2d7   :  { %v1224_v49 = vshll.u32 %v1223_v19, 16 }
 0x2d8   :  { %v1350_v15 = vpop.permute.xlu1 %1349 }
 0x2d9   :  { %vm1351_vm4 = vcmp.eq.s32.totalorder %v2339_v53, %v1350_v15  ;;  %vm1352_vm6 = vcmp.eq.s32.totalorder %v2342_v55, %v1350_v15  ;;  %v1316_v55 = vshll.u32 %v1315_v52, 16 }
 0x2da   :  { %v1353_v42 = vsel %vm1351_vm4, %v2358_v59, 0.0  ;;  %v1354_v44 = vsel %vm1352_vm6, %v2367_v61, 0.0 }
 0x2db   :  { %v1355_v45 = vsel %vm1097_vm7, %v1353_v42, 0.0  ;;  %v1356_v46 = vsel %vm1097_vm7, %v1354_v44, 0.0  ;;  %vm1065_vm7 = vcmp.lt.s32.totalorder %v2030_v43, 2 }
 0x2dc   :  { %v1357_v48 = vadd.f32 %v1356_v46, %v1355_v45 }
 0x2de   :  { %1358 = vadd.xlane.f32.xlu1 %v1357_v48 }
 0x2e2   :  { %1220 = vmin.xlane.f32.xlu1 %v1219_v51 }
 0x32f   :  { %v1313_v32 = vpop.xlane.xlu1 %1312 }
 0x330   :  { %v1314_v59 = vcvt.f32.s32 %v1313_v32 }
 0x332   :  { %v1317_v62 = vadd.s32 %v1316_v55, %v1314_v59 }
 0x333   :  { %v1410_v61 = vpop.xlane.xlu0 %1409  ;;  %v1154_v4 = vpop.xlane.xlu1 %1153 }
 0x334   :  { %v1604_v0 = vadd.s32 4294967128, %v1317_v62  ;;  %v1411_v1 = vcvt.f32.s32 %v1410_v61  ;;  %1841 = vlog2.f32 %v1154_v4 }
 0x336   :  { %v1414_v54 = vadd.s32 %v1413_v63, %v1411_v1  ;;  %vm1319_vm15 = vcmp.eq.s32.totalorder %v1604_v0, %v2411_v41 }
 0x337   :  { %vm1320_vm0 = vmand %vm1319_vm15, %vm1065_vm7  ;;  %v1246_v5 = vpop.xlane.xlu1 %1245  ;;  %v1262_v26 = vpop.xlane.xlu0 %1261 }
 0x338   :  { %v1606_v57 = vadd.s32 4294967117, %v1414_v54  ;;  %v1605_v2 = vsel %vm1320_vm0, 1.0, %v1872_v31  ;;  %1843 = vlog2.f32 %v1246_v5 }
 0x339   :  { %1324 = vrot.lane.b32.xlu0 %v1605_v2, %s1879_s3 }
 0x33a   :  { %vm1416_vm1 = vcmp.eq.s32.totalorder %v1606_v57, %v2411_v41 }
 0x33b   :  { %vm1417_vm2 = vmand %vm1416_vm1, %vm1065_vm7  ;;  %v1343_v8 = vpop.xlane.xlu1 %1342 }
 0x33c   :  { %v1607_v3 = vsel %vm1417_vm2, 1.0, %v1872_v31  ;;  %1845 = vlog2.f32 %v1343_v8 }
 0x33d   :  { %1421 = vrot.lane.b32.xlu1 %v1607_v3, %s1880_s23 }
 0x33e   :  { %v1842_v6 = vpop.eup %1841 }
 0x33f   :  { %v1156_v7 = vmul.f32 0.6931472, %v1842_v6  ;;  %v1169_v10 = vpop.xlane.xlu1 %1168 }
 0x341   :  { %v1157_v9 = vadd.f32 %v1156_v7, %v2406_v40 }
 0x342   :  { %v1844_v16 = vpop.eup %1843 }
 0x343   :  { %v1170_v11 = vsub.f32 %v1157_v9, %v1169_v10  ;;  %v1248_v58 = vmul.f32 0.6931472, %v1844_v16 }
 0x345   :  { %v1171_v12 = vsel %vm1065_vm7, %v1170_v11, 0.0  ;;  %v1249_v40 = vadd.f32 %v1248_v58, %v2385_v17 }
 0x346   :  { %v1173_v13 = vsel %vm1172_vm3, %v1171_v12, 0.0  ;;  %v1846_v21 = vpop.eup %1845 }
 0x347   :  { %v1345_v24 = vmul.f32 0.6931472, %v1846_v21  ;;  %v1263_v27 = vsub.f32 %v1249_v40, %v1262_v26 }
 0x349   :  { %v1346_v28 = vadd.f32 %v1345_v24, %v2390_v20  ;;  %v1264_v17 = vsel %vm1065_vm7, %v1263_v27, 0.0 }
 0x34a   :  { %v1265_v34 = vsel %vm1172_vm3, %v1264_v17, 0.0 }
 0x361   :  { %1174 = vadd.xlane.f32.xlu1 %v1173_v13 }
 0x36b   :  { %v1359_v18 = vpop.xlane.xlu1 %1358 }
 0x36c   :  { %v1360_v33 = vsub.f32 %v1346_v28, %v1359_v18 }
 0x36f   :  { %v1221_v22 = vpop.xlane.xlu1 %1220 }
 0x370   :  { %v1222_v23 = vcvt.f32.s32 %v1221_v22 }
 0x372   :  { %v1225_v25 = vadd.s32 %v1224_v49, %v1222_v23 }
 0x374   :  { %vm1226_vm8 = vcmp.eq.s32.totalorder %v1225_v25, %v2411_v41  ;;  %v1361_v41 = vsel %vm1065_vm7, %v1360_v33, 0.0 }
 0x375   :  { %vm1227_vm9 = vmand %vm1226_vm8, %vm1065_vm7  ;;  %v1362_v38 = vsel %vm1172_vm3, %v1361_v41, 0.0 }
 0x376   :  { %v1603_v29 = vsel %vm1227_vm9, 1.0, %v1872_v31 }
 0x377   :  { %v1230_v30 = vsel %vm1172_vm3, %v1603_v29, 0.0 }
 0x378   :  { %1231 = vadd.xlane.f32.xlu0 %v1230_v30 }
 0x37c   :  { %1266 = vadd.xlane.f32.xlu0 %v1265_v34 }
 0x380   :  { %1363 = vadd.xlane.f32.xlu0 %v1362_v38 }
 0x3ab   :  { %v1325_v35 = vpop.permute.xlu0 %1324 }
 0x3ac   :  { %v1327_v20 = vsel %vm1172_vm3, %v1325_v35, 0.0 }
 0x3ad   :  { %1328 = vadd.xlane.f32.xlu1 %v1327_v20 }
 0x3af   :  { %v1422_v31 = vpop.permute.xlu1 %1421 }
 0x3b0   :  { %v1424_v36 = vsel %vm1172_vm3, %v1422_v31, 0.0 }
 0x3b1   :  { %1425 = vadd.xlane.f32.xlu1 %v1424_v36 }
 0x3ee   :  { %v1175_v37 = vpop.xlane.xlu1 %1174 }
 0x3ef   :  { %v1176_v39 = vrot.slane %v1175_v37, 4 }
 0x3f1   :  { %v1177_v14 = vadd.f32 %v1176_v39, %v1175_v37 }
 0x3f3   :  { %v1178_v60 = vrot.slane %v1177_v14, 2 }
 0x3f5   :  { %v1179_v15 = vadd.f32 %v1178_v60, %v1177_v14 }
 0x3f7   :  { %v1180_v42 = vrot.slane %v1179_v15, 1 }
 0x3f9   :  { %v1181_v44 = vadd.f32 %v1180_v42, %v1179_v15 }
 0x3fb   :  { %1618 = vpush %v1181_v44 }
 0x3fc   :  { %1858 = shalt.err (!%p1855_p4)
}
 0x3fd   :  { %s1859_s29 = scalar_lea.hbm %s2529_s4, 64 }
 0x3fe   :  { %p1860_p5 = scmp.ne.s32.totalorder %s2529_s4, %s1859_s29  ;;  %p1863_p6 = scmp.lt.u32.totalorder %s1859_s29, %s2529_s4 }
 0x400   :  { %p1865_p7 = pnand %p1863_p6, %p1860_p5 }
 0x402   :  { %1868 = shalt.err (!%p1865_p7)
}
 0x403   :  { %1464 = dma.vmem_to_hbm [thread:$0]  %s1462_s25, 64, %s2529_s4, [#allocation3]   ;;  %vm1434_vm10 = vcmp.eq.s32.totalorder %v2339_v53, 0  ;;  %vm1437_vm11 = vcmp.eq.s32.totalorder %v2339_v53, 1  ;;  %vm1440_vm12 = vcmp.eq.s32.totalorder %v2339_v53, 2  ;;  %vm1443_vm5 = vcmp.eq.s32.totalorder %v2339_v53, 3 }
 0x404   :  { %vm1446_vm13 = vcmp.eq.s32.totalorder %v2339_v53, 4  ;;  %vm1449_vm4 = vcmp.eq.s32.totalorder %v2339_v53, 5  ;;  %vm1452_vm6 = vcmp.eq.s32.totalorder %v2030_v43, 0 }
 0x405   :  { %v1232_v45 = vpop.xlane.xlu0 %1231 }
 0x406   :  { %v1233_v46 = vrot.slane %v1232_v45, 4 }
 0x408   :  { %v1234_v47 = vadd.f32 %v1233_v46, %v1232_v45 }
 0x409   :  { %v1267_v48 = vpop.xlane.xlu0 %1266 }
 0x40a   :  { %v1235_v50 = vrot.slane %v1234_v47, 2  ;;  %v1268_v51 = vrot.slane %v1267_v48, 4 }
 0x40c   :  { %v1269_v52 = vadd.f32 %v1268_v51, %v1267_v48  ;;  %v1236_v32 = vadd.f32 %v1235_v50, %v1234_v47 }
 0x40d   :  { %v1364_v0 = vpop.xlane.xlu0 %1363 }
 0x40e   :  { %v1270_v55 = vrot.slane %v1269_v52, 2  ;;  %v1237_v56 = vrot.slane %v1236_v32, 1  ;;  %v1365_v1 = vrot.slane %v1364_v0, 4 }
 0x410   :  { %v1238_v59 = vadd.f32 %v1237_v56, %v1236_v32  ;;  %v1271_v62 = vadd.f32 %v1270_v55, %v1269_v52  ;;  %v1366_v54 = vadd.f32 %v1365_v1, %v1364_v0 }
 0x412   :  { %1620 = vpush %v1238_v59  ;;  %v1272_v61 = vrot.slane %v1271_v62, 1  ;;  %v1367_v57 = vrot.slane %v1366_v54, 2 }
 0x414   :  { %v1273_v63 = vadd.f32 %v1272_v61, %v1271_v62  ;;  %v1368_v5 = vadd.f32 %v1367_v57, %v1366_v54 }
 0x416   :  { %1622 = vpush %v1273_v63  ;;  %v1369_v11 = vrot.slane %v1368_v5, 1 }
 0x418   :  { %v1370_v19 = vadd.f32 %v1369_v11, %v1368_v5 }
 0x42c   :  { %s1619_s4 = spop %1618 }
 0x42d   :  { %v1435_v22 = vstv %s1619_s4 }
 0x42e   :  { %v1436_v40 = vsel %vm1434_vm10, %v1435_v22, 0.0 }
 0x43a   :  { %v1329_v2 = vpop.xlane.xlu1 %1328 }
 0x43b   :  { %v1330_v3 = vrot.slane %v1329_v2, 4 }
 0x43d   :  { %v1331_v4 = vadd.f32 %v1330_v3, %v1329_v2 }
 0x43e   :  { %v1426_v6 = vpop.xlane.xlu1 %1425 }
 0x43f   :  { %v1332_v7 = vrot.slane %v1331_v4, 2  ;;  %v1427_v8 = vrot.slane %v1426_v6, 4 }
 0x441   :  { %v1428_v9 = vadd.f32 %v1427_v8, %v1426_v6  ;;  %v1333_v10 = vadd.f32 %v1332_v7, %v1331_v4 }
 0x443   :  { %v1429_v12 = vrot.slane %v1428_v9, 2  ;;  %v1334_v13 = vrot.slane %v1333_v10, 1  ;;  %s1621_s11 = spop %1620 }
 0x444   :  { %v1444_v25 = vstv %s1621_s11 }
 0x445   :  { %v1430_v16 = vadd.f32 %v1429_v12, %v1428_v9  ;;  %v1335_v18 = vadd.f32 %v1334_v13, %v1333_v10 }
 0x447   :  { %1624 = vpush %v1335_v18  ;;  %v1431_v58 = vrot.slane %v1430_v16, 1  ;;  %s1623_s12 = spop %1622 }
 0x448   :  { %1626 = vpush %v1370_v19  ;;  %v1438_v49 = vstv %s1623_s12 }
 0x449   :  { %v1432_v21 = vadd.f32 %v1431_v58, %v1430_v16  ;;  %v1439_v23 = vsel %vm1437_vm11, %v1438_v49, %v1436_v40 }
 0x44b   :  { %1628 = vpush %v1432_v21 }
 0x478   :  { %s1625_s13 = spop %1624 }
 0x479   :  { %s1627_s14 = spop %1626  ;;  %v1447_v27 = vstv %s1625_s13 }
 0x47a   :  { %v1441_v24 = vstv %s1627_s14 }
 0x47b   :  { %v1442_v26 = vsel %vm1440_vm12, %v1441_v24, %v1439_v23 }
 0x47c   :  { %v1445_v28 = vsel %vm1443_vm5, %v1444_v25, %v1442_v26  ;;  %s1629_s15 = spop %1628 }
 0x47d   :  { %v1448_v29 = vsel %vm1446_vm13, %v1447_v27, %v1445_v28  ;;  %v1450_v30 = vstv %s1629_s15 }
 0x47e   :  { %v1451_v33 = vsel %vm1449_vm4, %v1450_v30, %v1448_v29 }
 0x47f   :  { %v1453_v17 = vsel %vm1452_vm6, %v1451_v33, 0.0 }
 0x480   :  { %1454 = vst [vmem:[%s2530_s5] sm:$0xff] %v1453_v17 }
 0x481   :  { %1869 = dma.done.wait [#allocation3], 64  }
 0x482   :  { %1870 = vsyncadd [#allocation3], 4294967232 }
 0x483   :  { %1472 = vsyncpa [#allocation3], 1 }

</bundles_post_ra>
